<compile_context>
chip_gen: v7x
topology: tpu7x:2x2x1
jax: 0.10.0
libtpu: 0.0.40
codegen_flags: <defaults>
</compile_context>

<pallas_src>
import functools

import jax
import jax.numpy as jnp
from jax.experimental import pallas as pl
from jax.experimental.pallas import tpu as pltpu


# bf16 MXU operands (f32 accumulation, f32 EUP/elementwise math).  Set to
# jnp.float32 for reference-grade numerics at higher per-step matmul latency.
MXU_DTYPE = jnp.bfloat16


def _lstm_con_kernel(x_ref, wih1_ref, b1_ref, wwide_ref, whh2_ref, b2_ref,
                     red_ref, out_ref, *, T, Bp, H):
    """Fused 2-layer LSTM + pairwise-mean reductions (skewed 2-layer pipeline).

    x_ref   : (T*Bp, I)   input sequence, time-major, flattened over (T, Bp)
    wih1    : (I, 4H)     layer-1 input weights (transposed; gate order i,f,g,o)
    b1      : (1, 4H)     layer-1 bias (b_ih + b_hh), f32
    wwide   : (H, 8H)     [Whh1^T | R @ Wih2^T]  (widened recurrent RHS)
    whh2    : (H, 4H)     layer-2 recurrent weights (transposed)
    b2      : (1, 4H)     layer-2 bias, f32
    red     : (H, H//2)   pairwise-mean matrix R (R[2j, j] = R[2j+1, j] = 0.5)
    out_ref : (T*Bp, H//2) final output
    """
    f32 = jnp.float32
    H4 = 4 * H
    mxu_dtype = wwide_ref.dtype

    # ---- Hoisted layer-1 input projection: one matmul over all T*Bp rows ----
    xp1 = jnp.dot(x_ref[...], wih1_ref[...],
                  preferred_element_type=f32) + b1_ref[...]       # (T*Bp, 4H)

    wwide = wwide_ref[...]          # (H, 8H), hoisted out of the loop
    whh2 = whh2_ref[...]            # (H, 4H)
    b2 = b2_ref[...]                # (1, 4H)
    red = red_ref[...]              # (H, H//2)

    def gate_math(gates, c):
        # PyTorch LSTM gate order i, f, g, o.  Two full-vreg EUP ops.
        sig = jax.nn.sigmoid(gates)
        th = jnp.tanh(gates)
        i_g = sig[:, 0 * H:1 * H]
        f_g = sig[:, 1 * H:2 * H]
        g_g = th[:, 2 * H:3 * H]
        o_g = sig[:, 3 * H:4 * H]
        c_new = f_g * c + i_g * g_g
        h_new = o_g * jnp.tanh(c_new)
        return h_new, c_new

    def layer2_step(s, h2, c2, xp2_s):
        # Layer-2 step s + its pairwise-mean output row.  Off the layer-1
        # critical chain (only needs h2_{s-1} and this iteration's xp2).
        gates2 = xp2_s + b2 + jnp.dot(h2.astype(mxu_dtype), whh2,
                                      preferred_element_type=f32)
        h2, c2 = gate_math(gates2, c2)
        out_ref[s * Bp:(s + 1) * Bp, :] = jnp.dot(h2, red,
                                                  preferred_element_type=f32)
        return h2, c2

    zeros = jnp.zeros((Bp, H), f32)
    h1, c1 = zeros, zeros
    h2, c2 = zeros, zeros

    # Fully unrolled skewed schedule: iteration t runs layer-1 step t and
    # layer-2 step t-1 (two independent matmul/EUP chains after the shared
    # widened matmul).
    for t in range(T):
        wide = jnp.dot(h1.astype(mxu_dtype), wwide,
                       preferred_element_type=f32)                 # (Bp, 8H)
        # wide[:, :4H]  = h1_{t-1} @ Whh1       -> layer-1 gates, step t
        # wide[:, 4H:]  = h1_{t-1} @ (R Wih2^T) -> layer-2 input proj, step t-1
        gates1 = xp1[t * Bp:(t + 1) * Bp, :] + wide[:, :H4]
        h1, c1 = gate_math(gates1, c1)
        if t > 0:
            h2, c2 = layer2_step(t - 1, h2, c2, wide[:, H4:])

    # Drain: layer-2 step T-1 (needs h1_{T-1} @ R Wih2^T).
    wide = jnp.dot(h1.astype(mxu_dtype), wwide, preferred_element_type=f32)
    layer2_step(T - 1, h2, c2, wide[:, H4:])


def prepare_lstm_con_params(params, mxu_dtype=MXU_DTYPE):
    """Precompute transposed / fused / widened weights once (outside the kernel)."""
    assert len(params) == 2, "fused kernel implements the default layers=2"
    (w_ih1, w_hh1, b_ih1, b_hh1), (w_ih2, w_hh2, b_ih2, b_hh2) = params
    f32 = jnp.float32
    H = w_hh1.shape[1]
    Hh = H // 2

    # Pairwise-mean as a matmul: R[2j, j] = R[2j+1, j] = 0.5.
    rows = jnp.arange(H)[:, None]
    cols = jnp.arange(Hh)[None, :]
    red = jnp.where(rows // 2 == cols, 0.5, 0.0).astype(f32)          # (H, Hh)

    wih1_t = jnp.transpose(w_ih1).astype(f32)                          # (I, 4H)
    whh1_t = jnp.transpose(w_hh1).astype(f32)                          # (H, 4H)
    b1 = (b_ih1 + b_hh1).reshape(1, -1).astype(f32)                    # (1, 4H)

    # Fuse layer-1 pairwise-mean into layer-2's input projection and widen the
    # layer-1 recurrent RHS so one per-step matmul produces both layer-1 gates
    # and layer-2's per-step input projection:
    #   h1 @ [Whh1^T | R @ Wih2^T]   -> (Bp, 8H)
    rw2 = jnp.dot(red, jnp.transpose(w_ih2).astype(f32))               # (H, 4H)
    wwide = jnp.concatenate([whh1_t, rw2], axis=1)                     # (H, 8H)
    whh2_t = jnp.transpose(w_hh2).astype(f32)                          # (H, 4H)
    b2 = (b_ih2 + b_hh2).reshape(1, -1).astype(f32)                    # (1, 4H)

    return (wih1_t.astype(mxu_dtype), b1, wwide.astype(mxu_dtype),
            whh2_t.astype(mxu_dtype), b2, red)


@jax.jit
def lstm_con_forward(x, prep):
    """LSTM_con.forward (layers=2, reduction='mean'). x: (T, B, I) -> (T, B, H//2)."""
    wih1, b1, wwide, whh2, b2, red = prep
    T, B, I = x.shape
    H = whh2.shape[0]
    Hh = H // 2
    # All layers share constructor args, so the reduced layer-1 output (H//2
    # features) must equal layer 2's input_size for the stack to be consistent.
    assert Hh == I, (Hh, I)

    # Pad batch to a full sublane tile: every per-step slice becomes an
    # unmasked (8, .) vreg tile and the MXU LHS has full rows.  Zero rows are
    # sliced off at the end (LSTM is independent per batch row).
    Bp = max(8, ((B + 7) // 8) * 8)
    x_pad = jnp.pad(x.astype(wwide.dtype), ((0, 0), (0, Bp - B), (0, 0)))
    x_pad = x_pad.reshape(T * Bp, I)

    kernel = functools.partial(_lstm_con_kernel, T=T, Bp=Bp, H=H)
    vmem = pl.BlockSpec(memory_space=pltpu.MemorySpace.VMEM)

    out = pl.pallas_call(
        kernel,
        out_shape=jax.ShapeDtypeStruct((T * Bp, Hh), jnp.float32),
        in_specs=[vmem] * 7,
        out_specs=vmem,
        # No grid: the recurrence is serial and the whole problem (~30 KiB of
        # operands) is VMEM/vreg resident on v5e/v6e/v7x.
    )(x_pad, wih1, b1, wwide, whh2, b2, red)

    return out.reshape(T, Bp, Hh)[:, :B, :]


# ------------------------- pure-JAX reference ----------------------------- #
def _lstm_ref(x, w_ih, w_hh, b_ih, b_hh):
    T, B, _ = x.shape
    H = w_hh.shape[1]

    def step(carry, x_t):
        h, c = carry
        gates = x_t @ w_ih.T + b_ih + h @ w_hh.T + b_hh
        i, f, g, o = jnp.split(gates, 4, axis=-1)
        i = jax.nn.sigmoid(i)
        f = jax.nn.sigmoid(f)
        g = jnp.tanh(g)
        o = jax.nn.sigmoid(o)
        c = f * c + i * g
        h = o * jnp.tanh(c)
        return (h, c), h

    init = (jnp.zeros((B, H), jnp.float32), jnp.zeros((B, H), jnp.float32))
    _, hs = jax.lax.scan(step, init, x)
    return hs                                              # (T, B, H)


def lstm_con_ref(x, params):
    for (w_ih, w_hh, b_ih, b_hh) in params:
        h = _lstm_ref(x, w_ih, w_hh, b_ih, b_hh)
        T, B, H = h.shape
        x = jnp.mean(h.reshape(T, B, H // 2, 2), axis=3)
    return x


# --------------------------------- main ----------------------------------- #
if __name__ == "__main__":
    # LSTM_con(input_size=16, hidden_size=32, layers=2, reduction='mean').
    # All layers share constructor args, so hidden_size must equal 2*input_size
    # for the stacked forward to be shape-consistent.
    T, B, I, H = 8, 2, 16, 32
    LAYERS = 2

    key = jax.random.PRNGKey(0)
    key, xk = jax.random.split(key)
    x = jax.random.normal(xk, (T, B, I), dtype=jnp.float32)

    k_init = 1.0 / jnp.sqrt(jnp.float32(H))
    params = []
    for _ in range(LAYERS):
        key, k1, k2, k3, k4 = jax.random.split(key, 5)
        w_ih = jax.random.uniform(k1, (4 * H, I), jnp.float32, -k_init, k_init)
        w_hh = jax.random.uniform(k2, (4 * H, H), jnp.float32, -k_init, k_init)
        b_ih = jax.random.uniform(k3, (4 * H,), jnp.float32, -k_init, k_init)
        b_hh = jax.random.uniform(k4, (4 * H,), jnp.float32, -k_init, k_init)
        params.append((w_ih, w_hh, b_ih, b_hh))

    prep = prepare_lstm_con_params(params, mxu_dtype=MXU_DTYPE)

    out = jax.block_until_ready(lstm_con_forward(x, prep))
    ref = jax.block_until_ready(lstm_con_ref(x, params))

    assert out.shape == (T, B, H // 2), out.shape
    # bf16 MXU operands (f32 accumulation) against an all-f32 reference need a
    # looser tolerance; structural errors would still be O(1).
    if MXU_DTYPE == jnp.bfloat16:
        rtol, atol = 3e-2, 3e-2
    else:
        rtol, atol = 1e-4, 5e-5
    max_err = float(jnp.max(jnp.abs(out - ref)))
    assert jnp.allclose(out, ref, rtol=rtol, atol=atol), max_err

    print("KERNEL_OK")
</pallas_src>

<mosaic_0001>
module attributes {stable_mosaic.version = 11 : i64} {
  func.func @_lstm_con_kernel(%arg0: memref<64x16xbf16, #tpu.memory_space<vmem>>, %arg1: memref<16x128xbf16, #tpu.memory_space<vmem>>, %arg2: memref<1x128xf32, #tpu.memory_space<vmem>>, %arg3: memref<32x256xbf16, #tpu.memory_space<vmem>>, %arg4: memref<32x128xbf16, #tpu.memory_space<vmem>>, %arg5: memref<1x128xf32, #tpu.memory_space<vmem>>, %arg6: memref<32x16xf32, #tpu.memory_space<vmem>>, %arg7: memref<64x16xf32, #tpu.memory_space<vmem>>) attributes {dimension_semantics = [], scalar_prefetch = 0 : i64, scratch_operands = 0 : i64, tpu.core_type = #tpu.core_type<tc>} {
    %c0 = arith.constant 0 : index
    %c0_0 = arith.constant 0 : index
    %0 = vector.load %arg0[%c0, %c0_0] : memref<64x16xbf16, #tpu.memory_space<vmem>>, vector<64x16xbf16>
    %c0_1 = arith.constant 0 : index
    %c0_2 = arith.constant 0 : index
    %1 = vector.load %arg1[%c0_1, %c0_2] : memref<16x128xbf16, #tpu.memory_space<vmem>>, vector<16x128xbf16>
    %cst = arith.constant dense<0.000000e+00> : vector<64x128xf32>
    %2 = tpu.matmul %0, %1, %cst {dimension_numbers = #tpu.dot_dimension_numbers<[1], [0], [0], [1], [0, 0, 1, 1], [], []>} : vector<64x16xbf16>, vector<16x128xbf16>, vector<64x128xf32> -> vector<64x128xf32>
    %c0_3 = arith.constant 0 : index
    %c0_4 = arith.constant 0 : index
    %3 = vector.load %arg2[%c0_3, %c0_4] : memref<1x128xf32, #tpu.memory_space<vmem>>, vector<1x128xf32>
    %4 = vector.broadcast %3 : vector<1x128xf32> to vector<64x128xf32>
    %5 = arith.addf %2, %4 : vector<64x128xf32>
    %c0_5 = arith.constant 0 : index
    %c0_6 = arith.constant 0 : index
    %6 = vector.load %arg3[%c0_5, %c0_6] : memref<32x256xbf16, #tpu.memory_space<vmem>>, vector<32x256xbf16>
    %c0_7 = arith.constant 0 : index
    %c0_8 = arith.constant 0 : index
    %7 = vector.load %arg4[%c0_7, %c0_8] : memref<32x128xbf16, #tpu.memory_space<vmem>>, vector<32x128xbf16>
    %c0_9 = arith.constant 0 : index
    %c0_10 = arith.constant 0 : index
    %8 = vector.load %arg5[%c0_9, %c0_10] : memref<1x128xf32, #tpu.memory_space<vmem>>, vector<1x128xf32>
    %c0_11 = arith.constant 0 : index
    %c0_12 = arith.constant 0 : index
    %9 = vector.load %arg6[%c0_11, %c0_12] : memref<32x16xf32, #tpu.memory_space<vmem>>, vector<32x16xf32>
    %cst_13 = arith.constant 0.000000e+00 : f32
    %10 = vector.broadcast %cst_13 : f32 to vector<8x32xf32>
    %11 = arith.truncf %10 : vector<8x32xf32> to vector<8x32xbf16>
    %cst_14 = arith.constant dense<0.000000e+00> : vector<8x256xf32>
    %12 = tpu.matmul %11, %6, %cst_14 {dimension_numbers = #tpu.dot_dimension_numbers<[1], [0], [0], [1], [0, 0, 1, 1], [], []>} : vector<8x32xbf16>, vector<32x256xbf16>, vector<8x256xf32> -> vector<8x256xf32>
    %13 = vector.extract_strided_slice %5 {offsets = [0, 0], sizes = [8, 128], strides = [1, 1]} : vector<64x128xf32> to vector<8x128xf32>
    %14 = vector.extract_strided_slice %12 {offsets = [0, 0], sizes = [8, 128], strides = [1, 1]} : vector<8x256xf32> to vector<8x128xf32>
    %15 = arith.addf %13, %14 : vector<8x128xf32>
    %16 = arith.negf %15 : vector<8x128xf32>
    %17 = math.exp %16 : vector<8x128xf32>
    %cst_15 = arith.constant 1.000000e+00 : f32
    %18 = vector.broadcast %cst_15 : f32 to vector<8x128xf32>
    %19 = arith.addf %18, %17 : vector<8x128xf32>
    %20 = arith.divf %18, %19 : vector<8x128xf32>
    %21 = math.tanh %15 : vector<8x128xf32>
    %22 = vector.extract_strided_slice %20 {offsets = [0, 0], sizes = [8, 32], strides = [1, 1]} : vector<8x128xf32> to vector<8x32xf32>
    %23 = vector.extract_strided_slice %20 {offsets = [0, 32], sizes = [8, 32], strides = [1, 1]} : vector<8x128xf32> to vector<8x32xf32>
    %24 = vector.extract_strided_slice %21 {offsets = [0, 64], sizes = [8, 32], strides = [1, 1]} : vector<8x128xf32> to vector<8x32xf32>
    %25 = vector.extract_strided_slice %20 {offsets = [0, 96], sizes = [8, 32], strides = [1, 1]} : vector<8x128xf32> to vector<8x32xf32>
    %26 = arith.mulf %23, %10 : vector<8x32xf32>
    %27 = arith.mulf %22, %24 : vector<8x32xf32>
    %28 = arith.addf %26, %27 : vector<8x32xf32>
    %29 = math.tanh %28 : vector<8x32xf32>
    %30 = arith.mulf %25, %29 : vector<8x32xf32>
    %31 = arith.truncf %30 : vector<8x32xf32> to vector<8x32xbf16>
    %cst_16 = arith.constant dense<0.000000e+00> : vector<8x256xf32>
    %32 = tpu.matmul %31, %6, %cst_16 {dimension_numbers = #tpu.dot_dimension_numbers<[1], [0], [0], [1], [0, 0, 1, 1], [], []>} : vector<8x32xbf16>, vector<32x256xbf16>, vector<8x256xf32> -> vector<8x256xf32>
    %33 = vector.extract_strided_slice %5 {offsets = [8, 0], sizes = [8, 128], strides = [1, 1]} : vector<64x128xf32> to vector<8x128xf32>
    %34 = vector.extract_strided_slice %32 {offsets = [0, 0], sizes = [8, 128], strides = [1, 1]} : vector<8x256xf32> to vector<8x128xf32>
    %35 = arith.addf %33, %34 : vector<8x128xf32>
    %36 = arith.negf %35 : vector<8x128xf32>
    %37 = math.exp %36 : vector<8x128xf32>
    %cst_17 = arith.constant 1.000000e+00 : f32
    %38 = vector.broadcast %cst_17 : f32 to vector<8x128xf32>
    %39 = arith.addf %38, %37 : vector<8x128xf32>
    %40 = arith.divf %38, %39 : vector<8x128xf32>
    %41 = math.tanh %35 : vector<8x128xf32>
    %42 = vector.extract_strided_slice %40 {offsets = [0, 0], sizes = [8, 32], strides = [1, 1]} : vector<8x128xf32> to vector<8x32xf32>
    %43 = vector.extract_strided_slice %40 {offsets = [0, 32], sizes = [8, 32], strides = [1, 1]} : vector<8x128xf32> to vector<8x32xf32>
    %44 = vector.extract_strided_slice %41 {offsets = [0, 64], sizes = [8, 32], strides = [1, 1]} : vector<8x128xf32> to vector<8x32xf32>
    %45 = vector.extract_strided_slice %40 {offsets = [0, 96], sizes = [8, 32], strides = [1, 1]} : vector<8x128xf32> to vector<8x32xf32>
    %46 = arith.mulf %43, %28 : vector<8x32xf32>
    %47 = arith.mulf %42, %44 : vector<8x32xf32>
    %48 = arith.addf %46, %47 : vector<8x32xf32>
    %49 = math.tanh %48 : vector<8x32xf32>
    %50 = arith.mulf %45, %49 : vector<8x32xf32>
    %51 = vector.extract_strided_slice %32 {offsets = [0, 128], sizes = [8, 128], strides = [1, 1]} : vector<8x256xf32> to vector<8x128xf32>
    %52 = vector.broadcast %8 : vector<1x128xf32> to vector<8x128xf32>
    %53 = arith.addf %51, %52 : vector<8x128xf32>
    %54 = arith.truncf %10 : vector<8x32xf32> to vector<8x32xbf16>
    %cst_18 = arith.constant dense<0.000000e+00> : vector<8x128xf32>
    %55 = tpu.matmul %54, %7, %cst_18 {dimension_numbers = #tpu.dot_dimension_numbers<[1], [0], [0], [1], [0, 0, 1, 1], [], []>} : vector<8x32xbf16>, vector<32x128xbf16>, vector<8x128xf32> -> vector<8x128xf32>
    %56 = arith.addf %53, %55 : vector<8x128xf32>
    %57 = arith.negf %56 : vector<8x128xf32>
    %58 = math.exp %57 : vector<8x128xf32>
    %cst_19 = arith.constant 1.000000e+00 : f32
    %59 = vector.broadcast %cst_19 : f32 to vector<8x128xf32>
    %60 = arith.addf %59, %58 : vector<8x128xf32>
    %61 = arith.divf %59, %60 : vector<8x128xf32>
    %62 = math.tanh %56 : vector<8x128xf32>
    %63 = vector.extract_strided_slice %61 {offsets = [0, 0], sizes = [8, 32], strides = [1, 1]} : vector<8x128xf32> to vector<8x32xf32>
    %64 = vector.extract_strided_slice %61 {offsets = [0, 32], sizes = [8, 32], strides = [1, 1]} : vector<8x128xf32> to vector<8x32xf32>
    %65 = vector.extract_strided_slice %62 {offsets = [0, 64], sizes = [8, 32], strides = [1, 1]} : vector<8x128xf32> to vector<8x32xf32>
    %66 = vector.extract_strided_slice %61 {offsets = [0, 96], sizes = [8, 32], strides = [1, 1]} : vector<8x128xf32> to vector<8x32xf32>
    %67 = arith.mulf %64, %10 : vector<8x32xf32>
    %68 = arith.mulf %63, %65 : vector<8x32xf32>
    %69 = arith.addf %67, %68 : vector<8x32xf32>
    %70 = math.tanh %69 : vector<8x32xf32>
    %71 = arith.mulf %66, %70 : vector<8x32xf32>
    %cst_20 = arith.constant dense<0.000000e+00> : vector<8x16xf32>
    %72 = tpu.matmul %71, %9, %cst_20 {dimension_numbers = #tpu.dot_dimension_numbers<[1], [0], [0], [1], [0, 0, 1, 1], [], []>} : vector<8x32xf32>, vector<32x16xf32>, vector<8x16xf32> -> vector<8x16xf32>
    %c0_21 = arith.constant 0 : index
    %c0_22 = arith.constant 0 : index
    %73 = vector.load %arg7[%c0_21, %c0_22] : memref<64x16xf32, #tpu.memory_space<vmem>>, vector<8x16xf32>
    tpu.vector_store %arg7[%c0_21, %c0_22], %72 {strides = array<i32>} : memref<64x16xf32, #tpu.memory_space<vmem>>, vector<8x16xf32>,
    %74 = arith.truncf %50 : vector<8x32xf32> to vector<8x32xbf16>
    %cst_23 = arith.constant dense<0.000000e+00> : vector<8x256xf32>
    %75 = tpu.matmul %74, %6, %cst_23 {dimension_numbers = #tpu.dot_dimension_numbers<[1], [0], [0], [1], [0, 0, 1, 1], [], []>} : vector<8x32xbf16>, vector<32x256xbf16>, vector<8x256xf32> -> vector<8x256xf32>
    %76 = vector.extract_strided_slice %5 {offsets = [16, 0], sizes = [8, 128], strides = [1, 1]} : vector<64x128xf32> to vector<8x128xf32>
    %77 = vector.extract_strided_slice %75 {offsets = [0, 0], sizes = [8, 128], strides = [1, 1]} : vector<8x256xf32> to vector<8x128xf32>
    %78 = arith.addf %76, %77 : vector<8x128xf32>
    %79 = arith.negf %78 : vector<8x128xf32>
    %80 = math.exp %79 : vector<8x128xf32>
    %cst_24 = arith.constant 1.000000e+00 : f32
    %81 = vector.broadcast %cst_24 : f32 to vector<8x128xf32>
    %82 = arith.addf %81, %80 : vector<8x128xf32>
    %83 = arith.divf %81, %82 : vector<8x128xf32>
    %84 = math.tanh %78 : vector<8x128xf32>
    %85 = vector.extract_strided_slice %83 {offsets = [0, 0], sizes = [8, 32], strides = [1, 1]} : vector<8x128xf32> to vector<8x32xf32>
    %86 = vector.extract_strided_slice %83 {offsets = [0, 32], sizes = [8, 32], strides = [1, 1]} : vector<8x128xf32> to vector<8x32xf32>
    %87 = vector.extract_strided_slice %84 {offsets = [0, 64], sizes = [8, 32], strides = [1, 1]} : vector<8x128xf32> to vector<8x32xf32>
    %88 = vector.extract_strided_slice %83 {offsets = [0, 96], sizes = [8, 32], strides = [1, 1]} : vector<8x128xf32> to vector<8x32xf32>
    %89 = arith.mulf %86, %48 : vector<8x32xf32>
    %90 = arith.mulf %85, %87 : vector<8x32xf32>
    %91 = arith.addf %89, %90 : vector<8x32xf32>
    %92 = math.tanh %91 : vector<8x32xf32>
    %93 = arith.mulf %88, %92 : vector<8x32xf32>
    %94 = vector.extract_strided_slice %75 {offsets = [0, 128], sizes = [8, 128], strides = [1, 1]} : vector<8x256xf32> to vector<8x128xf32>
    %95 = vector.broadcast %8 : vector<1x128xf32> to vector<8x128xf32>
    %96 = arith.addf %94, %95 : vector<8x128xf32>
    %97 = arith.truncf %71 : vector<8x32xf32> to vector<8x32xbf16>
    %cst_25 = arith.constant dense<0.000000e+00> : vector<8x128xf32>
    %98 = tpu.matmul %97, %7, %cst_25 {dimension_numbers = #tpu.dot_dimension_numbers<[1], [0], [0], [1], [0, 0, 1, 1], [], []>} : vector<8x32xbf16>, vector<32x128xbf16>, vector<8x128xf32> -> vector<8x128xf32>
    %99 = arith.addf %96, %98 : vector<8x128xf32>
    %100 = arith.negf %99 : vector<8x128xf32>
    %101 = math.exp %100 : vector<8x128xf32>
    %cst_26 = arith.constant 1.000000e+00 : f32
    %102 = vector.broadcast %cst_26 : f32 to vector<8x128xf32>
    %103 = arith.addf %102, %101 : vector<8x128xf32>
    %104 = arith.divf %102, %103 : vector<8x128xf32>
    %105 = math.tanh %99 : vector<8x128xf32>
    %106 = vector.extract_strided_slice %104 {offsets = [0, 0], sizes = [8, 32], strides = [1, 1]} : vector<8x128xf32> to vector<8x32xf32>
    %107 = vector.extract_strided_slice %104 {offsets = [0, 32], sizes = [8, 32], strides = [1, 1]} : vector<8x128xf32> to vector<8x32xf32>
    %108 = vector.extract_strided_slice %105 {offsets = [0, 64], sizes = [8, 32], strides = [1, 1]} : vector<8x128xf32> to vector<8x32xf32>
    %109 = vector.extract_strided_slice %104 {offsets = [0, 96], sizes = [8, 32], strides = [1, 1]} : vector<8x128xf32> to vector<8x32xf32>
    %110 = arith.mulf %107, %69 : vector<8x32xf32>
    %111 = arith.mulf %106, %108 : vector<8x32xf32>
    %112 = arith.addf %110, %111 : vector<8x32xf32>
    %113 = math.tanh %112 : vector<8x32xf32>
    %114 = arith.mulf %109, %113 : vector<8x32xf32>
    %cst_27 = arith.constant dense<0.000000e+00> : vector<8x16xf32>
    %115 = tpu.matmul %114, %9, %cst_27 {dimension_numbers = #tpu.dot_dimension_numbers<[1], [0], [0], [1], [0, 0, 1, 1], [], []>} : vector<8x32xf32>, vector<32x16xf32>, vector<8x16xf32> -> vector<8x16xf32>
    %c8 = arith.constant 8 : index
    %c0_28 = arith.constant 0 : index
    %116 = vector.load %arg7[%c8, %c0_28] : memref<64x16xf32, #tpu.memory_space<vmem>>, vector<8x16xf32>
    tpu.vector_store %arg7[%c8, %c0_28], %115 {strides = array<i32>} : memref<64x16xf32, #tpu.memory_space<vmem>>, vector<8x16xf32>,
    %117 = arith.truncf %93 : vector<8x32xf32> to vector<8x32xbf16>
    %cst_29 = arith.constant dense<0.000000e+00> : vector<8x256xf32>
    %118 = tpu.matmul %117, %6, %cst_29 {dimension_numbers = #tpu.dot_dimension_numbers<[1], [0], [0], [1], [0, 0, 1, 1], [], []>} : vector<8x32xbf16>, vector<32x256xbf16>, vector<8x256xf32> -> vector<8x256xf32>
    %119 = vector.extract_strided_slice %5 {offsets = [24, 0], sizes = [8, 128], strides = [1, 1]} : vector<64x128xf32> to vector<8x128xf32>
    %120 = vector.extract_strided_slice %118 {offsets = [0, 0], sizes = [8, 128], strides = [1, 1]} : vector<8x256xf32> to vector<8x128xf32>
    %121 = arith.addf %119, %120 : vector<8x128xf32>
    %122 = arith.negf %121 : vector<8x128xf32>
    %123 = math.exp %122 : vector<8x128xf32>
    %cst_30 = arith.constant 1.000000e+00 : f32
    %124 = vector.broadcast %cst_30 : f32 to vector<8x128xf32>
    %125 = arith.addf %124, %123 : vector<8x128xf32>
    %126 = arith.divf %124, %125 : vector<8x128xf32>
    %127 = math.tanh %121 : vector<8x128xf32>
    %128 = vector.extract_strided_slice %126 {offsets = [0, 0], sizes = [8, 32], strides = [1, 1]} : vector<8x128xf32> to vector<8x32xf32>
    %129 = vector.extract_strided_slice %126 {offsets = [0, 32], sizes = [8, 32], strides = [1, 1]} : vector<8x128xf32> to vector<8x32xf32>
    %130 = vector.extract_strided_slice %127 {offsets = [0, 64], sizes = [8, 32], strides = [1, 1]} : vector<8x128xf32> to vector<8x32xf32>
    %131 = vector.extract_strided_slice %126 {offsets = [0, 96], sizes = [8, 32], strides = [1, 1]} : vector<8x128xf32> to vector<8x32xf32>
    %132 = arith.mulf %129, %91 : vector<8x32xf32>
    %133 = arith.mulf %128, %130 : vector<8x32xf32>
    %134 = arith.addf %132, %133 : vector<8x32xf32>
    %135 = math.tanh %134 : vector<8x32xf32>
    %136 = arith.mulf %131, %135 : vector<8x32xf32>
    %137 = vector.extract_strided_slice %118 {offsets = [0, 128], sizes = [8, 128], strides = [1, 1]} : vector<8x256xf32> to vector<8x128xf32>
    %138 = vector.broadcast %8 : vector<1x128xf32> to vector<8x128xf32>
    %139 = arith.addf %137, %138 : vector<8x128xf32>
    %140 = arith.truncf %114 : vector<8x32xf32> to vector<8x32xbf16>
    %cst_31 = arith.constant dense<0.000000e+00> : vector<8x128xf32>
    %141 = tpu.matmul %140, %7, %cst_31 {dimension_numbers = #tpu.dot_dimension_numbers<[1], [0], [0], [1], [0, 0, 1, 1], [], []>} : vector<8x32xbf16>, vector<32x128xbf16>, vector<8x128xf32> -> vector<8x128xf32>
    %142 = arith.addf %139, %141 : vector<8x128xf32>
    %143 = arith.negf %142 : vector<8x128xf32>
    %144 = math.exp %143 : vector<8x128xf32>
    %cst_32 = arith.constant 1.000000e+00 : f32
    %145 = vector.broadcast %cst_32 : f32 to vector<8x128xf32>
    %146 = arith.addf %145, %144 : vector<8x128xf32>
    %147 = arith.divf %145, %146 : vector<8x128xf32>
    %148 = math.tanh %142 : vector<8x128xf32>
    %149 = vector.extract_strided_slice %147 {offsets = [0, 0], sizes = [8, 32], strides = [1, 1]} : vector<8x128xf32> to vector<8x32xf32>
    %150 = vector.extract_strided_slice %147 {offsets = [0, 32], sizes = [8, 32], strides = [1, 1]} : vector<8x128xf32> to vector<8x32xf32>
    %151 = vector.extract_strided_slice %148 {offsets = [0, 64], sizes = [8, 32], strides = [1, 1]} : vector<8x128xf32> to vector<8x32xf32>
    %152 = vector.extract_strided_slice %147 {offsets = [0, 96], sizes = [8, 32], strides = [1, 1]} : vector<8x128xf32> to vector<8x32xf32>
    %153 = arith.mulf %150, %112 : vector<8x32xf32>
    %154 = arith.mulf %149, %151 : vector<8x32xf32>
    %155 = arith.addf %153, %154 : vector<8x32xf32>
    %156 = math.tanh %155 : vector<8x32xf32>
    %157 = arith.mulf %152, %156 : vector<8x32xf32>
    %cst_33 = arith.constant dense<0.000000e+00> : vector<8x16xf32>
    %158 = tpu.matmul %157, %9, %cst_33 {dimension_numbers = #tpu.dot_dimension_numbers<[1], [0], [0], [1], [0, 0, 1, 1], [], []>} : vector<8x32xf32>, vector<32x16xf32>, vector<8x16xf32> -> vector<8x16xf32>
    %c16 = arith.constant 16 : index
    %c0_34 = arith.constant 0 : index
    %159 = vector.load %arg7[%c16, %c0_34] : memref<64x16xf32, #tpu.memory_space<vmem>>, vector<8x16xf32>
    tpu.vector_store %arg7[%c16, %c0_34], %158 {strides = array<i32>} : memref<64x16xf32, #tpu.memory_space<vmem>>, vector<8x16xf32>,
    %160 = arith.truncf %136 : vector<8x32xf32> to vector<8x32xbf16>
    %cst_35 = arith.constant dense<0.000000e+00> : vector<8x256xf32>
    %161 = tpu.matmul %160, %6, %cst_35 {dimension_numbers = #tpu.dot_dimension_numbers<[1], [0], [0], [1], [0, 0, 1, 1], [], []>} : vector<8x32xbf16>, vector<32x256xbf16>, vector<8x256xf32> -> vector<8x256xf32>
    %162 = vector.extract_strided_slice %5 {offsets = [32, 0], sizes = [8, 128], strides = [1, 1]} : vector<64x128xf32> to vector<8x128xf32>
    %163 = vector.extract_strided_slice %161 {offsets = [0, 0], sizes = [8, 128], strides = [1, 1]} : vector<8x256xf32> to vector<8x128xf32>
    %164 = arith.addf %162, %163 : vector<8x128xf32>
    %165 = arith.negf %164 : vector<8x128xf32>
    %166 = math.exp %165 : vector<8x128xf32>
    %cst_36 = arith.constant 1.000000e+00 : f32
    %167 = vector.broadcast %cst_36 : f32 to vector<8x128xf32>
    %168 = arith.addf %167, %166 : vector<8x128xf32>
    %169 = arith.divf %167, %168 : vector<8x128xf32>
    %170 = math.tanh %164 : vector<8x128xf32>
    %171 = vector.extract_strided_slice %169 {offsets = [0, 0], sizes = [8, 32], strides = [1, 1]} : vector<8x128xf32> to vector<8x32xf32>
    %172 = vector.extract_strided_slice %169 {offsets = [0, 32], sizes = [8, 32], strides = [1, 1]} : vector<8x128xf32> to vector<8x32xf32>
    %173 = vector.extract_strided_slice %170 {offsets = [0, 64], sizes = [8, 32], strides = [1, 1]} : vector<8x128xf32> to vector<8x32xf32>
    %174 = vector.extract_strided_slice %169 {offsets = [0, 96], sizes = [8, 32], strides = [1, 1]} : vector<8x128xf32> to vector<8x32xf32>
    %175 = arith.mulf %172, %134 : vector<8x32xf32>
    %176 = arith.mulf %171, %173 : vector<8x32xf32>
    %177 = arith.addf %175, %176 : vector<8x32xf32>
    %178 = math.tanh %177 : vector<8x32xf32>
    %179 = arith.mulf %174, %178 : vector<8x32xf32>
    %180 = vector.extract_strided_slice %161 {offsets = [0, 128], sizes = [8, 128], strides = [1, 1]} : vector<8x256xf32> to vector<8x128xf32>
    %181 = vector.broadcast %8 : vector<1x128xf32> to vector<8x128xf32>
    %182 = arith.addf %180, %181 : vector<8x128xf32>
    %183 = arith.truncf %157 : vector<8x32xf32> to vector<8x32xbf16>
    %cst_37 = arith.constant dense<0.000000e+00> : vector<8x128xf32>
    %184 = tpu.matmul %183, %7, %cst_37 {dimension_numbers = #tpu.dot_dimension_numbers<[1], [0], [0], [1], [0, 0, 1, 1], [], []>} : vector<8x32xbf16>, vector<32x128xbf16>, vector<8x128xf32> -> vector<8x128xf32>
    %185 = arith.addf %182, %184 : vector<8x128xf32>
    %186 = arith.negf %185 : vector<8x128xf32>
    %187 = math.exp %186 : vector<8x128xf32>
    %cst_38 = arith.constant 1.000000e+00 : f32
    %188 = vector.broadcast %cst_38 : f32 to vector<8x128xf32>
    %189 = arith.addf %188, %187 : vector<8x128xf32>
    %190 = arith.divf %188, %189 : vector<8x128xf32>
    %191 = math.tanh %185 : vector<8x128xf32>
    %192 = vector.extract_strided_slice %190 {offsets = [0, 0], sizes = [8, 32], strides = [1, 1]} : vector<8x128xf32> to vector<8x32xf32>
    %193 = vector.extract_strided_slice %190 {offsets = [0, 32], sizes = [8, 32], strides = [1, 1]} : vector<8x128xf32> to vector<8x32xf32>
    %194 = vector.extract_strided_slice %191 {offsets = [0, 64], sizes = [8, 32], strides = [1, 1]} : vector<8x128xf32> to vector<8x32xf32>
    %195 = vector.extract_strided_slice %190 {offsets = [0, 96], sizes = [8, 32], strides = [1, 1]} : vector<8x128xf32> to vector<8x32xf32>
    %196 = arith.mulf %193, %155 : vector<8x32xf32>
    %197 = arith.mulf %192, %194 : vector<8x32xf32>
    %198 = arith.addf %196, %197 : vector<8x32xf32>
    %199 = math.tanh %198 : vector<8x32xf32>
    %200 = arith.mulf %195, %199 : vector<8x32xf32>
    %cst_39 = arith.constant dense<0.000000e+00> : vector<8x16xf32>
    %201 = tpu.matmul %200, %9, %cst_39 {dimension_numbers = #tpu.dot_dimension_numbers<[1], [0], [0], [1], [0, 0, 1, 1], [], []>} : vector<8x32xf32>, vector<32x16xf32>, vector<8x16xf32> -> vector<8x16xf32>
    %c24 = arith.constant 24 : index
    %c0_40 = arith.constant 0 : index
    %202 = vector.load %arg7[%c24, %c0_40] : memref<64x16xf32, #tpu.memory_space<vmem>>, vector<8x16xf32>
    tpu.vector_store %arg7[%c24, %c0_40], %201 {strides = array<i32>} : memref<64x16xf32, #tpu.memory_space<vmem>>, vector<8x16xf32>,
    %203 = arith.truncf %179 : vector<8x32xf32> to vector<8x32xbf16>
    %cst_41 = arith.constant dense<0.000000e+00> : vector<8x256xf32>
    %204 = tpu.matmul %203, %6, %cst_41 {dimension_numbers = #tpu.dot_dimension_numbers<[1], [0], [0], [1], [0, 0, 1, 1], [], []>} : vector<8x32xbf16>, vector<32x256xbf16>, vector<8x256xf32> -> vector<8x256xf32>
    %205 = vector.extract_strided_slice %5 {offsets = [40, 0], sizes = [8, 128], strides = [1, 1]} : vector<64x128xf32> to vector<8x128xf32>
    %206 = vector.extract_strided_slice %204 {offsets = [0, 0], sizes = [8, 128], strides = [1, 1]} : vector<8x256xf32> to vector<8x128xf32>
    %207 = arith.addf %205, %206 : vector<8x128xf32>
    %208 = arith.negf %207 : vector<8x128xf32>
    %209 = math.exp %208 : vector<8x128xf32>
    %cst_42 = arith.constant 1.000000e+00 : f32
    %210 = vector.broadcast %cst_42 : f32 to vector<8x128xf32>
    %211 = arith.addf %210, %209 : vector<8x128xf32>
    %212 = arith.divf %210, %211 : vector<8x128xf32>
    %213 = math.tanh %207 : vector<8x128xf32>
    %214 = vector.extract_strided_slice %212 {offsets = [0, 0], sizes = [8, 32], strides = [1, 1]} : vector<8x128xf32> to vector<8x32xf32>
    %215 = vector.extract_strided_slice %212 {offsets = [0, 32], sizes = [8, 32], strides = [1, 1]} : vector<8x128xf32> to vector<8x32xf32>
    %216 = vector.extract_strided_slice %213 {offsets = [0, 64], sizes = [8, 32], strides = [1, 1]} : vector<8x128xf32> to vector<8x32xf32>
    %217 = vector.extract_strided_slice %212 {offsets = [0, 96], sizes = [8, 32], strides = [1, 1]} : vector<8x128xf32> to vector<8x32xf32>
    %218 = arith.mulf %215, %177 : vector<8x32xf32>
    %219 = arith.mulf %214, %216 : vector<8x32xf32>
    %220 = arith.addf %218, %219 : vector<8x32xf32>
    %221 = math.tanh %220 : vector<8x32xf32>
    %222 = arith.mulf %217, %221 : vector<8x32xf32>
    %223 = vector.extract_strided_slice %204 {offsets = [0, 128], sizes = [8, 128], strides = [1, 1]} : vector<8x256xf32> to vector<8x128xf32>
    %224 = vector.broadcast %8 : vector<1x128xf32> to vector<8x128xf32>
    %225 = arith.addf %223, %224 : vector<8x128xf32>
    %226 = arith.truncf %200 : vector<8x32xf32> to vector<8x32xbf16>
    %cst_43 = arith.constant dense<0.000000e+00> : vector<8x128xf32>
    %227 = tpu.matmul %226, %7, %cst_43 {dimension_numbers = #tpu.dot_dimension_numbers<[1], [0], [0], [1], [0, 0, 1, 1], [], []>} : vector<8x32xbf16>, vector<32x128xbf16>, vector<8x128xf32> -> vector<8x128xf32>
    %228 = arith.addf %225, %227 : vector<8x128xf32>
    %229 = arith.negf %228 : vector<8x128xf32>
    %230 = math.exp %229 : vector<8x128xf32>
    %cst_44 = arith.constant 1.000000e+00 : f32
    %231 = vector.broadcast %cst_44 : f32 to vector<8x128xf32>
    %232 = arith.addf %231, %230 : vector<8x128xf32>
    %233 = arith.divf %231, %232 : vector<8x128xf32>
    %234 = math.tanh %228 : vector<8x128xf32>
    %235 = vector.extract_strided_slice %233 {offsets = [0, 0], sizes = [8, 32], strides = [1, 1]} : vector<8x128xf32> to vector<8x32xf32>
    %236 = vector.extract_strided_slice %233 {offsets = [0, 32], sizes = [8, 32], strides = [1, 1]} : vector<8x128xf32> to vector<8x32xf32>
    %237 = vector.extract_strided_slice %234 {offsets = [0, 64], sizes = [8, 32], strides = [1, 1]} : vector<8x128xf32> to vector<8x32xf32>
    %238 = vector.extract_strided_slice %233 {offsets = [0, 96], sizes = [8, 32], strides = [1, 1]} : vector<8x128xf32> to vector<8x32xf32>
    %239 = arith.mulf %236, %198 : vector<8x32xf32>
    %240 = arith.mulf %235, %237 : vector<8x32xf32>
    %241 = arith.addf %239, %240 : vector<8x32xf32>
    %242 = math.tanh %241 : vector<8x32xf32>
    %243 = arith.mulf %238, %242 : vector<8x32xf32>
    %cst_45 = arith.constant dense<0.000000e+00> : vector<8x16xf32>
    %244 = tpu.matmul %243, %9, %cst_45 {dimension_numbers = #tpu.dot_dimension_numbers<[1], [0], [0], [1], [0, 0, 1, 1], [], []>} : vector<8x32xf32>, vector<32x16xf32>, vector<8x16xf32> -> vector<8x16xf32>
    %c32 = arith.constant 32 : index
    %c0_46 = arith.constant 0 : index
    %245 = vector.load %arg7[%c32, %c0_46] : memref<64x16xf32, #tpu.memory_space<vmem>>, vector<8x16xf32>
    tpu.vector_store %arg7[%c32, %c0_46], %244 {strides = array<i32>} : memref<64x16xf32, #tpu.memory_space<vmem>>, vector<8x16xf32>,
    %246 = arith.truncf %222 : vector<8x32xf32> to vector<8x32xbf16>
    %cst_47 = arith.constant dense<0.000000e+00> : vector<8x256xf32>
    %247 = tpu.matmul %246, %6, %cst_47 {dimension_numbers = #tpu.dot_dimension_numbers<[1], [0], [0], [1], [0, 0, 1, 1], [], []>} : vector<8x32xbf16>, vector<32x256xbf16>, vector<8x256xf32> -> vector<8x256xf32>
    %248 = vector.extract_strided_slice %5 {offsets = [48, 0], sizes = [8, 128], strides = [1, 1]} : vector<64x128xf32> to vector<8x128xf32>
    %249 = vector.extract_strided_slice %247 {offsets = [0, 0], sizes = [8, 128], strides = [1, 1]} : vector<8x256xf32> to vector<8x128xf32>
    %250 = arith.addf %248, %249 : vector<8x128xf32>
    %251 = arith.negf %250 : vector<8x128xf32>
    %252 = math.exp %251 : vector<8x128xf32>
    %cst_48 = arith.constant 1.000000e+00 : f32
    %253 = vector.broadcast %cst_48 : f32 to vector<8x128xf32>
    %254 = arith.addf %253, %252 : vector<8x128xf32>
    %255 = arith.divf %253, %254 : vector<8x128xf32>
    %256 = math.tanh %250 : vector<8x128xf32>
    %257 = vector.extract_strided_slice %255 {offsets = [0, 0], sizes = [8, 32], strides = [1, 1]} : vector<8x128xf32> to vector<8x32xf32>
    %258 = vector.extract_strided_slice %255 {offsets = [0, 32], sizes = [8, 32], strides = [1, 1]} : vector<8x128xf32> to vector<8x32xf32>
    %259 = vector.extract_strided_slice %256 {offsets = [0, 64], sizes = [8, 32], strides = [1, 1]} : vector<8x128xf32> to vector<8x32xf32>
    %260 = vector.extract_strided_slice %255 {offsets = [0, 96], sizes = [8, 32], strides = [1, 1]} : vector<8x128xf32> to vector<8x32xf32>
    %261 = arith.mulf %258, %220 : vector<8x32xf32>
    %262 = arith.mulf %257, %259 : vector<8x32xf32>
    %263 = arith.addf %261, %262 : vector<8x32xf32>
    %264 = math.tanh %263 : vector<8x32xf32>
    %265 = arith.mulf %260, %264 : vector<8x32xf32>
    %266 = vector.extract_strided_slice %247 {offsets = [0, 128], sizes = [8, 128], strides = [1, 1]} : vector<8x256xf32> to vector<8x128xf32>
    %267 = vector.broadcast %8 : vector<1x128xf32> to vector<8x128xf32>
    %268 = arith.addf %266, %267 : vector<8x128xf32>
    %269 = arith.truncf %243 : vector<8x32xf32> to vector<8x32xbf16>
    %cst_49 = arith.constant dense<0.000000e+00> : vector<8x128xf32>
    %270 = tpu.matmul %269, %7, %cst_49 {dimension_numbers = #tpu.dot_dimension_numbers<[1], [0], [0], [1], [0, 0, 1, 1], [], []>} : vector<8x32xbf16>, vector<32x128xbf16>, vector<8x128xf32> -> vector<8x128xf32>
    %271 = arith.addf %268, %270 : vector<8x128xf32>
    %272 = arith.negf %271 : vector<8x128xf32>
    %273 = math.exp %272 : vector<8x128xf32>
    %cst_50 = arith.constant 1.000000e+00 : f32
    %274 = vector.broadcast %cst_50 : f32 to vector<8x128xf32>
    %275 = arith.addf %274, %273 : vector<8x128xf32>
    %276 = arith.divf %274, %275 : vector<8x128xf32>
    %277 = math.tanh %271 : vector<8x128xf32>
    %278 = vector.extract_strided_slice %276 {offsets = [0, 0], sizes = [8, 32], strides = [1, 1]} : vector<8x128xf32> to vector<8x32xf32>
    %279 = vector.extract_strided_slice %276 {offsets = [0, 32], sizes = [8, 32], strides = [1, 1]} : vector<8x128xf32> to vector<8x32xf32>
    %280 = vector.extract_strided_slice %277 {offsets = [0, 64], sizes = [8, 32], strides = [1, 1]} : vector<8x128xf32> to vector<8x32xf32>
    %281 = vector.extract_strided_slice %276 {offsets = [0, 96], sizes = [8, 32], strides = [1, 1]} : vector<8x128xf32> to vector<8x32xf32>
    %282 = arith.mulf %279, %241 : vector<8x32xf32>
    %283 = arith.mulf %278, %280 : vector<8x32xf32>
    %284 = arith.addf %282, %283 : vector<8x32xf32>
    %285 = math.tanh %284 : vector<8x32xf32>
    %286 = arith.mulf %281, %285 : vector<8x32xf32>
    %cst_51 = arith.constant dense<0.000000e+00> : vector<8x16xf32>
    %287 = tpu.matmul %286, %9, %cst_51 {dimension_numbers = #tpu.dot_dimension_numbers<[1], [0], [0], [1], [0, 0, 1, 1], [], []>} : vector<8x32xf32>, vector<32x16xf32>, vector<8x16xf32> -> vector<8x16xf32>
    %c40 = arith.constant 40 : index
    %c0_52 = arith.constant 0 : index
    %288 = vector.load %arg7[%c40, %c0_52] : memref<64x16xf32, #tpu.memory_space<vmem>>, vector<8x16xf32>
    tpu.vector_store %arg7[%c40, %c0_52], %287 {strides = array<i32>} : memref<64x16xf32, #tpu.memory_space<vmem>>, vector<8x16xf32>,
    %289 = arith.truncf %265 : vector<8x32xf32> to vector<8x32xbf16>
    %cst_53 = arith.constant dense<0.000000e+00> : vector<8x256xf32>
    %290 = tpu.matmul %289, %6, %cst_53 {dimension_numbers = #tpu.dot_dimension_numbers<[1], [0], [0], [1], [0, 0, 1, 1], [], []>} : vector<8x32xbf16>, vector<32x256xbf16>, vector<8x256xf32> -> vector<8x256xf32>
    %291 = vector.extract_strided_slice %5 {offsets = [56, 0], sizes = [8, 128], strides = [1, 1]} : vector<64x128xf32> to vector<8x128xf32>
    %292 = vector.extract_strided_slice %290 {offsets = [0, 0], sizes = [8, 128], strides = [1, 1]} : vector<8x256xf32> to vector<8x128xf32>
    %293 = arith.addf %291, %292 : vector<8x128xf32>
    %294 = arith.negf %293 : vector<8x128xf32>
    %295 = math.exp %294 : vector<8x128xf32>
    %cst_54 = arith.constant 1.000000e+00 : f32
    %296 = vector.broadcast %cst_54 : f32 to vector<8x128xf32>
    %297 = arith.addf %296, %295 : vector<8x128xf32>
    %298 = arith.divf %296, %297 : vector<8x128xf32>
    %299 = math.tanh %293 : vector<8x128xf32>
    %300 = vector.extract_strided_slice %298 {offsets = [0, 0], sizes = [8, 32], strides = [1, 1]} : vector<8x128xf32> to vector<8x32xf32>
    %301 = vector.extract_strided_slice %298 {offsets = [0, 32], sizes = [8, 32], strides = [1, 1]} : vector<8x128xf32> to vector<8x32xf32>
    %302 = vector.extract_strided_slice %299 {offsets = [0, 64], sizes = [8, 32], strides = [1, 1]} : vector<8x128xf32> to vector<8x32xf32>
    %303 = vector.extract_strided_slice %298 {offsets = [0, 96], sizes = [8, 32], strides = [1, 1]} : vector<8x128xf32> to vector<8x32xf32>
    %304 = arith.mulf %301, %263 : vector<8x32xf32>
    %305 = arith.mulf %300, %302 : vector<8x32xf32>
    %306 = arith.addf %304, %305 : vector<8x32xf32>
    %307 = math.tanh %306 : vector<8x32xf32>
    %308 = arith.mulf %303, %307 : vector<8x32xf32>
    %309 = vector.extract_strided_slice %290 {offsets = [0, 128], sizes = [8, 128], strides = [1, 1]} : vector<8x256xf32> to vector<8x128xf32>
    %310 = vector.broadcast %8 : vector<1x128xf32> to vector<8x128xf32>
    %311 = arith.addf %309, %310 : vector<8x128xf32>
    %312 = arith.truncf %286 : vector<8x32xf32> to vector<8x32xbf16>
    %cst_55 = arith.constant dense<0.000000e+00> : vector<8x128xf32>
    %313 = tpu.matmul %312, %7, %cst_55 {dimension_numbers = #tpu.dot_dimension_numbers<[1], [0], [0], [1], [0, 0, 1, 1], [], []>} : vector<8x32xbf16>, vector<32x128xbf16>, vector<8x128xf32> -> vector<8x128xf32>
    %314 = arith.addf %311, %313 : vector<8x128xf32>
    %315 = arith.negf %314 : vector<8x128xf32>
    %316 = math.exp %315 : vector<8x128xf32>
    %cst_56 = arith.constant 1.000000e+00 : f32
    %317 = vector.broadcast %cst_56 : f32 to vector<8x128xf32>
    %318 = arith.addf %317, %316 : vector<8x128xf32>
    %319 = arith.divf %317, %318 : vector<8x128xf32>
    %320 = math.tanh %314 : vector<8x128xf32>
    %321 = vector.extract_strided_slice %319 {offsets = [0, 0], sizes = [8, 32], strides = [1, 1]} : vector<8x128xf32> to vector<8x32xf32>
    %322 = vector.extract_strided_slice %319 {offsets = [0, 32], sizes = [8, 32], strides = [1, 1]} : vector<8x128xf32> to vector<8x32xf32>
    %323 = vector.extract_strided_slice %320 {offsets = [0, 64], sizes = [8, 32], strides = [1, 1]} : vector<8x128xf32> to vector<8x32xf32>
    %324 = vector.extract_strided_slice %319 {offsets = [0, 96], sizes = [8, 32], strides = [1, 1]} : vector<8x128xf32> to vector<8x32xf32>
    %325 = arith.mulf %322, %284 : vector<8x32xf32>
    %326 = arith.mulf %321, %323 : vector<8x32xf32>
    %327 = arith.addf %325, %326 : vector<8x32xf32>
    %328 = math.tanh %327 : vector<8x32xf32>
    %329 = arith.mulf %324, %328 : vector<8x32xf32>
    %cst_57 = arith.constant dense<0.000000e+00> : vector<8x16xf32>
    %330 = tpu.matmul %329, %9, %cst_57 {dimension_numbers = #tpu.dot_dimension_numbers<[1], [0], [0], [1], [0, 0, 1, 1], [], []>} : vector<8x32xf32>, vector<32x16xf32>, vector<8x16xf32> -> vector<8x16xf32>
    %c48 = arith.constant 48 : index
    %c0_58 = arith.constant 0 : index
    %331 = vector.load %arg7[%c48, %c0_58] : memref<64x16xf32, #tpu.memory_space<vmem>>, vector<8x16xf32>
    tpu.vector_store %arg7[%c48, %c0_58], %330 {strides = array<i32>} : memref<64x16xf32, #tpu.memory_space<vmem>>, vector<8x16xf32>,
    %332 = arith.truncf %308 : vector<8x32xf32> to vector<8x32xbf16>
    %cst_59 = arith.constant dense<0.000000e+00> : vector<8x256xf32>
    %333 = tpu.matmul %332, %6, %cst_59 {dimension_numbers = #tpu.dot_dimension_numbers<[1], [0], [0], [1], [0, 0, 1, 1], [], []>} : vector<8x32xbf16>, vector<32x256xbf16>, vector<8x256xf32> -> vector<8x256xf32>
    %334 = vector.extract_strided_slice %333 {offsets = [0, 128], sizes = [8, 128], strides = [1, 1]} : vector<8x256xf32> to vector<8x128xf32>
    %335 = vector.broadcast %8 : vector<1x128xf32> to vector<8x128xf32>
    %336 = arith.addf %334, %335 : vector<8x128xf32>
    %337 = arith.truncf %329 : vector<8x32xf32> to vector<8x32xbf16>
    %cst_60 = arith.constant dense<0.000000e+00> : vector<8x128xf32>
    %338 = tpu.matmul %337, %7, %cst_60 {dimension_numbers = #tpu.dot_dimension_numbers<[1], [0], [0], [1], [0, 0, 1, 1], [], []>} : vector<8x32xbf16>, vector<32x128xbf16>, vector<8x128xf32> -> vector<8x128xf32>
    %339 = arith.addf %336, %338 : vector<8x128xf32>
    %340 = arith.negf %339 : vector<8x128xf32>
    %341 = math.exp %340 : vector<8x128xf32>
    %cst_61 = arith.constant 1.000000e+00 : f32
    %342 = vector.broadcast %cst_61 : f32 to vector<8x128xf32>
    %343 = arith.addf %342, %341 : vector<8x128xf32>
    %344 = arith.divf %342, %343 : vector<8x128xf32>
    %345 = math.tanh %339 : vector<8x128xf32>
    %346 = vector.extract_strided_slice %344 {offsets = [0, 0], sizes = [8, 32], strides = [1, 1]} : vector<8x128xf32> to vector<8x32xf32>
    %347 = vector.extract_strided_slice %344 {offsets = [0, 32], sizes = [8, 32], strides = [1, 1]} : vector<8x128xf32> to vector<8x32xf32>
    %348 = vector.extract_strided_slice %345 {offsets = [0, 64], sizes = [8, 32], strides = [1, 1]} : vector<8x128xf32> to vector<8x32xf32>
    %349 = vector.extract_strided_slice %344 {offsets = [0, 96], sizes = [8, 32], strides = [1, 1]} : vector<8x128xf32> to vector<8x32xf32>
    %350 = arith.mulf %347, %327 : vector<8x32xf32>
    %351 = arith.mulf %346, %348 : vector<8x32xf32>
    %352 = arith.addf %350, %351 : vector<8x32xf32>
    %353 = math.tanh %352 : vector<8x32xf32>
    %354 = arith.mulf %349, %353 : vector<8x32xf32>
    %cst_62 = arith.constant dense<0.000000e+00> : vector<8x16xf32>
    %355 = tpu.matmul %354, %9, %cst_62 {dimension_numbers = #tpu.dot_dimension_numbers<[1], [0], [0], [1], [0, 0, 1, 1], [], []>} : vector<8x32xf32>, vector<32x16xf32>, vector<8x16xf32> -> vector<8x16xf32>
    %c56 = arith.constant 56 : index
    %c0_63 = arith.constant 0 : index
    %356 = vector.load %arg7[%c56, %c0_63] : memref<64x16xf32, #tpu.memory_space<vmem>>, vector<8x16xf32>
    tpu.vector_store %arg7[%c56, %c0_63], %355 {strides = array<i32>} : memref<64x16xf32, #tpu.memory_space<vmem>>, vector<8x16xf32>,
    return
  }
}

</mosaic_0001>

<bundles_post_ra>
// kernel: lstm_con_forward.1
= control target key start
LH: loop header
LB: loop body
LE: loop exit
PB: predicated region body
PF: predicated region fallthrough
CT: control target
= control target key end

     0   :  { %v2505_v1 = vmov 0   ;;  %vm70_vm0 = vcmask 130048   ;;  %s2506_s16 = smov 64   ;;  %s2507_s17 = smov 32   ;;  %v2508_v31 = vmov 0.0   ;;  %vm2509_vm1 = vmmov 0   ;;  %s3006_s1 = inlined_call_operand.vmem [shape: bf16[16,128], index: 1, kind: input, shape index: {}]   ;;  %s3007_s3 = inlined_call_operand.vmem [shape: bf16[32,256], index: 3, kind: input, shape index: {}]   ;;  %s3008_s0 = inlined_call_operand.vmem [shape: bf16[64,16], index: 0, kind: input, shape index: {}]   ;;  %s3009_s2 = inlined_call_operand.vmem [shape: f32[1,128], index: 2, kind: input, shape index: {}]   ;;  %s3010_s4 = inlined_call_operand.vmem [shape: bf16[32,128], index: 4, kind: input, shape index: {}]   ;;  %s3011_s5 = inlined_call_operand.vmem [shape: f32[1,128], index: 5, kind: input, shape index: {}]   ;;  %s3012_s6 = inlined_call_operand.vmem [shape: f32[32,16], index: 6, kind: input, shape index: {}]   ;;  %s3013_s7 = inlined_call_operand.vmem [shape: f32[64,16], index: 7, kind: output, shape index: {}]  }
   0x1   :  { %v2356_v0 = vld [vmem:[%s3006_s1] sm:$0xff]   ;;  %217 = vmatprep.mubr.bf16.mxu1 %v2505_v1  ;;  %v2361_v5 = vld [vmem:[%s3008_s0 + $0x8] sm:$0xff]   ;;  %v2577_v6 = vld [vmem:[%s3007_s3 + $0x14] ss:$8 sps:$4 sm:$0xff]   ;;  %vm181_vm2 = vcmask 261120  }
   0x2   :  { %v2558_v2 = vld [vmem:[%s3007_s3 + $0x4] ss:$8 sps:$4 sm:$0xff]   ;;  %2140 = vmatprep.subr.bf16.mxu0 %v2356_v0  ;;  %v2563_v3 = vld [vmem:[%s3007_s3] ss:$8 sps:$4 sm:$0xff]   ;;  %v2582_v7 = vld [vmem:[%s3007_s3 + $0x10] ss:$8 sps:$4 sm:$0xff]  }
   0x3   :  { %185 = vmatprep.subr.bf16.mxu1 %v2558_v2  ;;  %2141 = vmatpush3.bf16.msra.mxu0 %v2356_v0  ;;  %v2360_v4 = vld [vmem:[%s3008_s0] sm:$0xff]   ;;  %v2366_v29 = vld [vmem:[%s3008_s0 + $0x10] sm:$0xff]   ;;  %v2367_v30 = vld [vmem:[%s3008_s0 + $0x18] sm:$0xff]  }
   0x4   :  { %186 = vmatpush1.bf16.msra.mxu1 %v2563_v3  ;;  %2142 = vmatprep.mubr.msk.bf16.mxu0 %vm70_vm0, %v2360_v4  ;;  %v2596_v8 = vld [vmem:[%s3009_s2] ss:$0 sm:$0xff]  ;;  %v2627_v33 = vld [vmem:[%s3010_s4 + $0x8] sm:$0xff]  }
   0x5   :  { %187 = vmatprep.subr.bf16.mxu1 %v2577_v6  ;;  %2150 = vmatprep.subr.bf16.mxu0 %v2508_v31  ;;  %v2620_v32 = vld [vmem:[%s3010_s4] sm:$0xff]  }
   0x6   :  { %2143 = vmatmul.mubr.msk.bf16.vlgmr.msra.gmra.mrb[0].mxu0 %vm70_vm0, %v2361_v5  ;;  %v2658_v48 = vld [vmem:[%s3011_s5] ss:$0 sm:$0xff] }
   0x7   :  { %2146 = vmatprep.mubr.msk.bf16.mxu0 %vm70_vm0, %v2366_v29  ;;  %2151 = vmatpush3.bf16.msra.mxu0 %v2620_v32 }
   0x8   :  { %188 = vmatpush1.bf16.msra.mxu1 %v2582_v7  ;;  %2152 = vmatprep.subr.bf16.mxu0 %v2508_v31 }
   0x9   :  { %257 = vmatprep.subr.bf16.mxu1 %v2558_v2 }
   0xb   :  { %218 = vmatmul.mubr.bf16.vlgmr.msra.gmra.mrb[0].mxu1 %v2505_v1  ;;  %2153 = vmatpush3.bf16.msra.mxu0 %v2627_v33 }
   0xc   :  { %258 = vmatpush1.bf16.msra.mxu1 %v2563_v3  ;;  %289 = vmatprep.mubr.bf16.mxu1 %v2505_v1 }
   0xd   :  { %259 = vmatprep.subr.bf16.mxu1 %v2577_v6  ;;  %490 = vmatprep.subr.bf16.mxu0 %v2558_v2 }
   0xe   :  { %2147 = vmatmul.mubr.msk.bf16.gmra.mrb[4].mxu0 %vm70_vm0, %v2367_v30 }
   0xf   :  { %2154 = vmatprep.mubr.msk.bf16.mxu0 %vm2509_vm1, %v2508_v31 }
  0x10   :  { %260 = vmatpush1.bf16.msra.mxu1 %v2582_v7 }
  0x16   :  { %2155 = vmatmul.mubr.bf16.vlgmr.msra.gmra.mrb[8].mxu0 %v2505_v1 }
  0x17   :  { %491 = vmatpush1.bf16.msra.mxu0 %v2563_v3  ;;  %522 = vmatprep.mubr.bf16.mxu0 %v2505_v1 }
  0x18   :  { %492 = vmatprep.subr.bf16.mxu0 %v2577_v6 }
  0x1b   :  { %493 = vmatpush1.bf16.msra.mxu0 %v2582_v7 }
  0xd9   :  { %v2598_v9 = vpop.f32.mrb[0].mxu0 }
  0xda   :  { %v117_v10 = vpop.f32.mrb[1].mxu0 }
  0xdb   :  { %v118_v11 = vadd.f32 %v2596_v8, %v117_v10  ;;  %v2601_v12 = vpop.f32.mrb[2].mxu0 }
  0xdc   :  { %v2603_v13 = vpop.f32.mrb[3].mxu0 }
  0xdd   :  { %v121_v47 = vadd.f32 %v2596_v8, %v2603_v13 }
  0xde   :  { %v219_v14 = vpop.f32.mrb[0].mxu1 }
  0xdf   :  { %v225_v15 = vadd.f32 %v219_v14, %v118_v11  ;;  %v221_v16 = vpop.f32.mrb[1].mxu1 }
  0xe0   :  { %v222_v17 = vpop.f32.mrb[2].mxu1 }
  0xe1   :  { %2369 = vtanh.f32 %v225_v15  ;;  %v223_v18 = vpop.f32.mrb[3].mxu1  ;;  %v2029_v20 = vmul.f32 -1.442695, %v225_v15  ;;  %v2642_v38 = vpop.f32.mrb[4].mxu0 }
  0xe2   :  { %v2644_v39 = vpop.f32.mrb[5].mxu0 }
  0xe3   :  { %2371 = vpow2.f32 %v2029_v20  ;;  %v2646_v40 = vpop.f32.mrb[6].mxu0  ;;  %v2510_v20 = vmov 0.0|0.0  }
  0xe4   :  { %v2648_v41 = vpop.f32.mrb[7].mxu0  ;;  %2302 = vmatprep.subr.bf16.mxu1 %v2510_v20  ;;  %2308 = vmatprep.subr.bf16.mxu0 %v2510_v20 }
  0xe9   :  { %v376_v43 = vpop.f32.mrb[8].mxu0 }
  0xea   :  { %v2156_v44 = vpop.f32.mrb[9].mxu0 }
  0xeb   :  { %v2370_v19 = vpop.eup %2369  ;;  %v379_v45 = vpop.f32.mrb[10].mxu0 }
  0xec   :  { %235 = vrot.lane.b32.xlu0 %v2370_v19, %s2506_s16  ;;  %v2157_v46 = vpop.f32.mrb[11].mxu0  ;;  %v126_v45 = vadd.f32 %v2598_v9, %v2596_v8 }
  0xed   :  { %v2372_v21 = vpop.eup %2371 }
  0xee   :  { %v229_v22 = vadd.f32 1.0, %v2372_v21  ;;  %v157_v21 = vld [vmem:[%s3012_s6] sm:$0xff] }
  0xf0   :  { %2373 = vrcp.f32 %v229_v22  ;;  %v158_v22 = vld [vmem:[%s3012_s6 + $0x8] sm:$0xff] }
  0xfa   :  { %v2374_v23 = vpop.eup %2373 }
  0xfb   :  { %v233_v26 = vmul.f32 0.0, %v2374_v23 }
 0x15e   :  { %v236_v24 = vpop.permute.xlu0 %235 }
 0x15f   :  { %v238_v25 = vmul.f32 %v2374_v23, %v236_v24  ;;  %v2683_v24 = vpack.c.bf16 %v158_v22, %v157_v21 }
 0x161   :  { %240 = vrot.lane.b32.xlu0 %v238_v25, %s2507_s17  ;;  %v160_v25 = vld [vmem:[%s3012_s6 + $0x18] sm:$0xff] }
 0x1d3   :  { %v241_v27 = vpop.permute.xlu0 %240 }
 0x1d4   :  { %v2607_v28 = vadd.f32 %v241_v27, %v233_v26 }
 0x1d6   :  { %2375 = vtanh.f32 %v2607_v28 }
 0x1e0   :  { %v2376_v34 = vpop.eup %2375 }
 0x1e1   :  { %246 = vrot.lane.b32.xlu1 %v2376_v34, %s2506_s16 }
 0x253   :  { %v247_v35 = vpop.permute.xlu1 %246 }
 0x254   :  { %v249_v36 = vmul.f32 %v2374_v23, %v247_v35  ;;  %v159_v23 = vld [vmem:[%s3012_s6 + $0x10] sm:$0xff] }
 0x255   :  { %v2690_v27 = vpack.c.bf16 %v160_v25, %v159_v23 }
 0x256   :  { %v250_v37 = vpack.c.bf16 %v249_v36, %v249_v36 }
 0x258   :  { %252 = vrot.lane.b32.xlu1 %v250_v37, %s2507_s17 }
 0x2ca   :  { %v253_v42 = vpop.permute.xlu1 %252 }
 0x2cb   :  { %2030 = vmatmul.mubr.msk.bf16.vlgmr.msra.gmra.mrb[4].mxu1 %vm181_vm2, %v253_v42 }
 0x2cc   :  { %2166 = vmatprep.mubr.msk.f32.mxu1 %vm2509_vm1, %v2508_v31  ;;  %2304 = vmatpush3.bf16.msra.mxu1 %v2683_v24 }
 0x2cd   :  { %2305 = vmatprep.subr.bf16.mxu1 %v2510_v20 }
 0x2d0   :  { %2307 = vmatpush3.bf16.msra.mxu1 %v2690_v27 }
 0x2d1   :  { %2169 = vmatprep.subr.bf16.mxu1 %v2508_v31 }
 0x39e   :  { %v291_v49 = vpop.f32.mrb[4].mxu1 }
 0x39f   :  { %v298_v50 = vadd.f32 %v291_v49, %v121_v47  ;;  %v293_v51 = vpop.f32.mrb[5].mxu1 }
 0x3a0   :  { %v329_v52 = vadd.f32 %v2658_v48, %v293_v51  ;;  %v295_v53 = vpop.f32.mrb[6].mxu1 }
 0x3a1   :  { %2377 = vtanh.f32 %v298_v50  ;;  %v296_v54 = vpop.f32.mrb[7].mxu1  ;;  %v2031_v58 = vmul.f32 -1.442695, %v298_v50 }
 0x3a2   :  { %v382_v55 = vadd.f32 %v376_v43, %v329_v52 }
 0x3a4   :  { %2379 = vtanh.f32 %v382_v55  ;;  %v2035_v59 = vmul.f32 -1.442695, %v382_v55 }
 0x3a5   :  { %2381 = vpow2.f32 %v2031_v58 }
 0x3a6   :  { %2383 = vpow2.f32 %v2035_v59 }
 0x3ab   :  { %v2378_v56 = vpop.eup %2377 }
 0x3ac   :  { %308 = vrot.lane.b32.xlu1 %v2378_v56, %s2506_s16 }
 0x3ae   :  { %v2380_v57 = vpop.eup %2379 }
 0x3af   :  { %392 = vrot.lane.b32.xlu0 %v2380_v57, %s2506_s16  ;;  %v2382_v60 = vpop.eup %2381 }
 0x3b0   :  { %v2384_v61 = vpop.eup %2383  ;;  %v302_v62 = vadd.f32 1.0, %v2382_v60 }
 0x3b1   :  { %v386_v63 = vadd.f32 1.0, %v2384_v61 }
 0x3b2   :  { %2385 = vrcp.f32 %v302_v62 }
 0x3b3   :  { %2387 = vrcp.f32 %v386_v63 }
 0x3bc   :  { %v2386_v0 = vpop.eup %2385 }
 0x3bd   :  { %v2388_v10 = vpop.eup %2387  ;;  %v306_v14 = vmul.f32 %v2386_v0, %v2607_v28 }
 0x3be   :  { %v390_v17 = vmul.f32 0.0, %v2388_v10 }
 0x41e   :  { %v309_v4 = vpop.permute.xlu1 %308 }
 0x41f   :  { %v311_v5 = vmul.f32 %v2386_v0, %v309_v4 }
 0x421   :  { %313 = vrot.lane.b32.xlu1 %v311_v5, %s2507_s17  ;;  %v393_v11 = vpop.permute.xlu0 %392 }
 0x422   :  { %v395_v13 = vmul.f32 %v2388_v10, %v393_v11 }
 0x424   :  { %397 = vrot.lane.b32.xlu0 %v395_v13, %s2507_s17 }
 0x493   :  { %v314_v15 = vpop.permute.xlu1 %313 }
 0x494   :  { %v2666_v16 = vadd.f32 %v314_v15, %v306_v14 }
 0x496   :  { %2389 = vtanh.f32 %v2666_v16  ;;  %v398_v18 = vpop.permute.xlu0 %397 }
 0x497   :  { %v2669_v19 = vadd.f32 %v398_v18, %v390_v17 }
 0x499   :  { %2391 = vtanh.f32 %v2669_v19 }
 0x4a0   :  { %v2390_v26 = vpop.eup %2389 }
 0x4a1   :  { %319 = vrot.lane.b32.xlu1 %v2390_v26, %s2506_s16 }
 0x4a3   :  { %v2392_v28 = vpop.eup %2391 }
 0x4a4   :  { %403 = vrot.lane.b32.xlu0 %v2392_v28, %s2506_s16 }
 0x513   :  { %v320_v29 = vpop.permute.xlu1 %319 }
 0x514   :  { %v322_v30 = vmul.f32 %v2386_v0, %v320_v29 }
 0x516   :  { %v483_v34 = vpack.c.bf16 %v322_v30, %v322_v30  ;;  %v404_v35 = vpop.permute.xlu0 %403 }
 0x517   :  { %v406_v36 = vmul.f32 %v2388_v10, %v404_v35 }
 0x518   :  { %485 = vrot.lane.b32.xlu1 %v483_v34, %s2507_s17 }
 0x519   :  { %408 = vrot.lane.b32.xlu0 %v406_v36, %s2507_s17  ;;  %v557_v37 = vpack.c.bf16 %v406_v36, %v406_v36 }
 0x51d   :  { %559 = vrot.lane.b32.xlu0 %v557_v37, %s2507_s17 }
 0x58a   :  { %v486_v42 = vpop.permute.xlu1 %485 }
 0x58b   :  { %2037 = vmatmul.mubr.msk.bf16.vlgmr.msra.gmra.mrb[12].mxu0 %vm181_vm2, %v486_v42  ;;  %v409_v43 = vpop.permute.xlu0 %408 }
 0x58c   :  { %2167 = vmatmul.mubr.msk.f32.vlgmr.msra.gmra.mrb[8].mxu1 %vm181_vm2, %v409_v43  ;;  %2310 = vmatpush3.bf16.msra.mxu0 %v2683_v24 }
 0x58d   :  { %2170 = vmatpush3.bf16.msra.mxu1 %v2620_v32  ;;  %2173 = vmatprep.mubr.msk.bf16.mxu1 %vm2509_vm1, %v2508_v31 }
 0x58e   :  { %2171 = vmatprep.subr.bf16.mxu1 %v2508_v31  ;;  %2311 = vmatprep.subr.bf16.mxu0 %v2510_v20 }
 0x58f   :  { %2185 = vmatprep.mubr.msk.f32.mxu0 %vm2509_vm1, %v2508_v31  ;;  %v560_v44 = vpop.permute.xlu0 %559 }
 0x590   :  { %2313 = vmatpush3.bf16.msra.mxu0 %v2690_v27 }
 0x591   :  { %2172 = vmatpush3.bf16.msra.mxu1 %v2627_v33  ;;  %2188 = vmatprep.subr.bf16.mxu0 %v2508_v31 }
 0x592   :  { %712 = vmatprep.subr.bf16.mxu1 %v2558_v2 }
 0x594   :  { %2174 = vmatmul.mubr.msk.bf16.vlgmr.msra.gmra.mrb[12].mxu1 %vm181_vm2, %v560_v44  ;;  %v129_v44 = vadd.f32 %v2601_v12, %v2596_v8 }
 0x595   :  { %713 = vmatpush1.bf16.msra.mxu1 %v2563_v3  ;;  %744 = vmatprep.mubr.bf16.mxu1 %v2505_v1 }
 0x596   :  { %714 = vmatprep.subr.bf16.mxu1 %v2577_v6 }
 0x599   :  { %715 = vmatpush1.bf16.msra.mxu1 %v2582_v7 }
 0x59a   :  { %2314 = vmatprep.subr.bf16.mxu1 %v2510_v20 }
 0x65e   :  { %v524_v46 = vpop.f32.mrb[12].mxu0 }
 0x65f   :  { %v531_v47 = vadd.f32 %v524_v46, %v126_v45  ;;  %v478_v49 = vpop.f32.mrb[8].mxu1  ;;  %v526_v50 = vpop.f32.mrb[13].mxu0 }
 0x660   :  { %482 = vst.msk [vmem:[%s3013_s7] sm:$0xff] %vm70_vm0, %v478_v49  ;;  %v2168_v51 = vpop.f32.mrb[9].mxu1  ;;  %v528_v52 = vpop.f32.mrb[14].mxu0  ;;  %v556_v54 = vadd.f32 %v2658_v48, %v526_v50 }
 0x661   :  { %2393 = vtanh.f32 %v531_v47  ;;  %v529_v53 = vpop.f32.mrb[15].mxu0  ;;  %v2038_v61 = vmul.f32 -1.442695, %v531_v47 }
 0x667   :  { %v598_v55 = vpop.f32.mrb[12].mxu1 }
 0x668   :  { %v604_v56 = vadd.f32 %v598_v55, %v556_v54  ;;  %v2175_v57 = vpop.f32.mrb[13].mxu1 }
 0x669   :  { %v601_v58 = vpop.f32.mrb[14].mxu1 }
 0x66a   :  { %2395 = vtanh.f32 %v604_v56  ;;  %v2176_v9 = vpop.f32.mrb[15].mxu1  ;;  %v2040_v62 = vmul.f32 -1.442695, %v604_v56 }
 0x66b   :  { %v2394_v59 = vpop.eup %2393  ;;  %2397 = vpow2.f32 %v2038_v61 }
 0x66c   :  { %541 = vrot.lane.b32.xlu0 %v2394_v59, %s2506_s16  ;;  %2399 = vpow2.f32 %v2040_v62 }
 0x674   :  { %v2396_v60 = vpop.eup %2395 }
 0x675   :  { %614 = vrot.lane.b32.xlu1 %v2396_v60, %s2506_s16  ;;  %v2398_v63 = vpop.eup %2397 }
 0x676   :  { %v535_v0 = vadd.f32 1.0, %v2398_v63  ;;  %v2400_v4 = vpop.eup %2399 }
 0x677   :  { %v608_v5 = vadd.f32 1.0, %v2400_v4 }
 0x678   :  { %2401 = vrcp.f32 %v535_v0 }
 0x679   :  { %2403 = vrcp.f32 %v608_v5 }
 0x682   :  { %v2402_v10 = vpop.eup %2401 }
 0x683   :  { %v2404_v14 = vpop.eup %2403  ;;  %v539_v18 = vmul.f32 %v2402_v10, %v2666_v16 }
 0x684   :  { %v612_v23 = vmul.f32 %v2404_v14, %v2669_v19 }
 0x6de   :  { %v542_v11 = vpop.permute.xlu0 %541 }
 0x6df   :  { %v544_v13 = vmul.f32 %v2402_v10, %v542_v11 }
 0x6e1   :  { %546 = vrot.lane.b32.xlu0 %v544_v13, %s2507_s17 }
 0x6e7   :  { %v615_v15 = vpop.permute.xlu1 %614 }
 0x6e8   :  { %v617_v17 = vmul.f32 %v2404_v14, %v615_v15 }
 0x6ea   :  { %619 = vrot.lane.b32.xlu1 %v617_v17, %s2507_s17 }
 0x753   :  { %v547_v21 = vpop.permute.xlu0 %546 }
 0x754   :  { %v2731_v22 = vadd.f32 %v547_v21, %v539_v18 }
 0x756   :  { %2405 = vtanh.f32 %v2731_v22 }
 0x75c   :  { %v620_v25 = vpop.permute.xlu1 %619 }
 0x75d   :  { %v2735_v26 = vadd.f32 %v620_v25, %v612_v23 }
 0x75f   :  { %2407 = vtanh.f32 %v2735_v26 }
 0x760   :  { %v2406_v28 = vpop.eup %2405 }
 0x761   :  { %552 = vrot.lane.b32.xlu0 %v2406_v28, %s2506_s16 }
 0x769   :  { %v2408_v29 = vpop.eup %2407 }
 0x76a   :  { %625 = vrot.lane.b32.xlu1 %v2408_v29, %s2506_s16 }
 0x7d3   :  { %v553_v30 = vpop.permute.xlu0 %552 }
 0x7d4   :  { %v555_v16 = vmul.f32 %v2402_v10, %v553_v30 }
 0x7d6   :  { %v705_v34 = vpack.c.bf16 %v555_v16, %v555_v16 }
 0x7d8   :  { %707 = vrot.lane.b32.xlu0 %v705_v34, %s2507_s17 }
 0x7dc   :  { %v626_v35 = vpop.permute.xlu1 %625 }
 0x7dd   :  { %v628_v36 = vmul.f32 %v2404_v14, %v626_v35 }
 0x7df   :  { %630 = vrot.lane.b32.xlu1 %v628_v36, %s2507_s17  ;;  %v779_v19 = vpack.c.bf16 %v628_v36, %v628_v36 }
 0x7e3   :  { %781 = vrot.lane.b32.xlu1 %v779_v19, %s2507_s17 }
 0x84a   :  { %v708_v37 = vpop.permute.xlu0 %707 }
 0x84b   :  { %2042 = vmatmul.mubr.msk.bf16.vlgmr.msra.gmra.mrb[16].mxu1 %vm181_vm2, %v708_v37 }
 0x84c   :  { %2316 = vmatpush3.bf16.msra.mxu1 %v2683_v24  ;;  %2204 = vmatprep.mubr.msk.f32.mxu1 %vm2509_vm1, %v2508_v31 }
 0x84d   :  { %2317 = vmatprep.subr.bf16.mxu1 %v2510_v20 }
 0x850   :  { %2319 = vmatpush3.bf16.msra.mxu1 %v2690_v27 }
 0x851   :  { %v631_v42 = vpop.permute.xlu1 %630  ;;  %2207 = vmatprep.subr.bf16.mxu1 %v2508_v31 }
 0x852   :  { %2186 = vmatmul.mubr.msk.f32.vlgmr.msra.gmra.mrb[16].mxu0 %vm181_vm2, %v631_v42  ;;  %v134_v42 = vadd.f32 %v2596_v8, %v2644_v39 }
 0x853   :  { %2189 = vmatpush3.bf16.msra.mxu0 %v2620_v32  ;;  %2192 = vmatprep.mubr.msk.bf16.mxu0 %vm2509_vm1, %v2508_v31 }
 0x854   :  { %2190 = vmatprep.subr.bf16.mxu0 %v2508_v31 }
 0x855   :  { %v782_v43 = vpop.permute.xlu1 %781 }
 0x857   :  { %2191 = vmatpush3.bf16.msra.mxu0 %v2627_v33 }
 0x858   :  { %934 = vmatprep.subr.bf16.mxu0 %v2558_v2 }
 0x85a   :  { %2193 = vmatmul.mubr.msk.bf16.vlgmr.msra.gmra.mrb[20].mxu0 %vm181_vm2, %v782_v43 }
 0x85b   :  { %935 = vmatpush1.bf16.msra.mxu0 %v2563_v3  ;;  %966 = vmatprep.mubr.bf16.mxu0 %v2505_v1 }
 0x85c   :  { %936 = vmatprep.subr.bf16.mxu0 %v2577_v6 }
 0x85f   :  { %937 = vmatpush1.bf16.msra.mxu0 %v2582_v7 }
 0x860   :  { %2320 = vmatprep.subr.bf16.mxu0 %v2510_v20 }
 0x91e   :  { %v746_v45 = vpop.f32.mrb[16].mxu1 }
 0x91f   :  { %v753_v46 = vadd.f32 %v746_v45, %v129_v44  ;;  %v748_v47 = vpop.f32.mrb[17].mxu1 }
 0x920   :  { %v750_v49 = vpop.f32.mrb[18].mxu1  ;;  %v778_v54 = vadd.f32 %v2658_v48, %v748_v47 }
 0x921   :  { %2409 = vtanh.f32 %v753_v46  ;;  %v751_v50 = vpop.f32.mrb[19].mxu1  ;;  %v2043_v59 = vmul.f32 -1.442695, %v753_v46 }
 0x925   :  { %v700_v51 = vpop.f32.mrb[16].mxu0 }
 0x926   :  { %704 = vst.msk [vmem:[%s3013_s7 + $0x8] sm:$0xff] %vm70_vm0, %v700_v51  ;;  %v2187_v52 = vpop.f32.mrb[17].mxu0 }
 0x92b   :  { %v2410_v53 = vpop.eup %2409 }
 0x92c   :  { %763 = vrot.lane.b32.xlu1 %v2410_v53, %s2506_s16 }
 0x92d   :  { %v820_v55 = vpop.f32.mrb[20].mxu0 }
 0x92e   :  { %v826_v12 = vadd.f32 %v820_v55, %v778_v54  ;;  %v2194_v56 = vpop.f32.mrb[21].mxu0 }
 0x92f   :  { %v823_v57 = vpop.f32.mrb[22].mxu0 }
 0x930   :  { %v2195_v58 = vpop.f32.mrb[23].mxu0  ;;  %2411 = vtanh.f32 %v826_v12  ;;  %v2045_v61 = vmul.f32 -1.442695, %v826_v12 }
 0x931   :  { %2413 = vpow2.f32 %v2043_v59 }
 0x932   :  { %2415 = vpow2.f32 %v2045_v61 }
 0x93a   :  { %v2412_v9 = vpop.eup %2411 }
 0x93b   :  { %836 = vrot.lane.b32.xlu0 %v2412_v9, %s2506_s16  ;;  %v2414_v60 = vpop.eup %2413 }
 0x93c   :  { %v757_v62 = vadd.f32 1.0, %v2414_v60  ;;  %v2416_v63 = vpop.eup %2415 }
 0x93d   :  { %v830_v10 = vadd.f32 1.0, %v2416_v63 }
 0x93e   :  { %2417 = vrcp.f32 %v757_v62 }
 0x93f   :  { %2419 = vrcp.f32 %v830_v10 }
 0x948   :  { %v2418_v0 = vpop.eup %2417 }
 0x949   :  { %v2420_v11 = vpop.eup %2419  ;;  %v761_v15 = vmul.f32 %v2418_v0, %v2731_v22 }
 0x94a   :  { %v834_v23 = vmul.f32 %v2420_v11, %v2735_v26 }
 0x99e   :  { %v764_v4 = vpop.permute.xlu1 %763 }
 0x99f   :  { %v766_v5 = vmul.f32 %v2418_v0, %v764_v4 }
 0x9a1   :  { %768 = vrot.lane.b32.xlu1 %v766_v5, %s2507_s17 }
 0x9ad   :  { %v837_v13 = vpop.permute.xlu0 %836 }
 0x9ae   :  { %v839_v14 = vmul.f32 %v2420_v11, %v837_v13 }
 0x9b0   :  { %841 = vrot.lane.b32.xlu0 %v839_v14, %s2507_s17 }
 0xa13   :  { %v769_v17 = vpop.permute.xlu1 %768 }
 0xa14   :  { %v2775_v18 = vadd.f32 %v769_v17, %v761_v15 }
 0xa16   :  { %2421 = vtanh.f32 %v2775_v18 }
 0xa20   :  { %v2422_v21 = vpop.eup %2421 }
 0xa21   :  { %774 = vrot.lane.b32.xlu1 %v2422_v21, %s2506_s16 }
 0xa22   :  { %v842_v25 = vpop.permute.xlu0 %841 }
 0xa23   :  { %v2780_v28 = vadd.f32 %v842_v25, %v834_v23 }
 0xa25   :  { %2423 = vtanh.f32 %v2780_v28 }
 0xa2f   :  { %v2424_v29 = vpop.eup %2423 }
 0xa30   :  { %847 = vrot.lane.b32.xlu0 %v2424_v29, %s2506_s16 }
 0xa93   :  { %v775_v30 = vpop.permute.xlu1 %774 }
 0xa94   :  { %v777_v22 = vmul.f32 %v2418_v0, %v775_v30 }
 0xa96   :  { %v927_v16 = vpack.c.bf16 %v777_v22, %v777_v22 }
 0xa98   :  { %929 = vrot.lane.b32.xlu1 %v927_v16, %s2507_s17 }
 0xaa2   :  { %v848_v34 = vpop.permute.xlu0 %847 }
 0xaa3   :  { %v850_v35 = vmul.f32 %v2420_v11, %v848_v34 }
 0xaa5   :  { %852 = vrot.lane.b32.xlu0 %v850_v35, %s2507_s17  ;;  %v1001_v36 = vpack.c.bf16 %v850_v35, %v850_v35 }
 0xaa9   :  { %1003 = vrot.lane.b32.xlu0 %v1001_v36, %s2507_s17 }
 0xb0a   :  { %v930_v26 = vpop.permute.xlu1 %929 }
 0xb0b   :  { %2047 = vmatmul.mubr.msk.bf16.vlgmr.msra.gmra.mrb[24].mxu0 %vm181_vm2, %v930_v26  ;;  %v137_v26 = vadd.f32 %v2596_v8, %v2648_v41 }
 0xb0c   :  { %2322 = vmatpush3.bf16.msra.mxu0 %v2683_v24  ;;  %2223 = vmatprep.mubr.msk.f32.mxu0 %vm2509_vm1, %v2508_v31 }
 0xb0d   :  { %2323 = vmatprep.subr.bf16.mxu0 %v2510_v20 }
 0xb10   :  { %2325 = vmatpush3.bf16.msra.mxu0 %v2690_v27 }
 0xb11   :  { %2226 = vmatprep.subr.bf16.mxu0 %v2508_v31 }
 0xb17   :  { %v853_v19 = vpop.permute.xlu0 %852 }
 0xb18   :  { %2205 = vmatmul.mubr.msk.f32.vlgmr.msra.gmra.mrb[10].mxu1 %vm181_vm2, %v853_v19 }
 0xb19   :  { %2208 = vmatpush3.bf16.msra.mxu1 %v2620_v32  ;;  %2211 = vmatprep.mubr.msk.bf16.mxu1 %vm2509_vm1, %v2508_v31 }
 0xb1a   :  { %2209 = vmatprep.subr.bf16.mxu1 %v2508_v31 }
 0xb1b   :  { %v1004_v37 = vpop.permute.xlu0 %1003 }
 0xb1d   :  { %2210 = vmatpush3.bf16.msra.mxu1 %v2627_v33 }
 0xb1e   :  { %1156 = vmatprep.subr.bf16.mxu1 %v2558_v2 }
 0xb20   :  { %2212 = vmatmul.mubr.msk.bf16.vlgmr.msra.gmra.mrb[20].mxu1 %vm181_vm2, %v1004_v37 }
 0xb21   :  { %1157 = vmatpush1.bf16.msra.mxu1 %v2563_v3  ;;  %1188 = vmatprep.mubr.bf16.mxu1 %v2505_v1 }
 0xb22   :  { %1158 = vmatprep.subr.bf16.mxu1 %v2577_v6 }
 0xb25   :  { %1159 = vmatpush1.bf16.msra.mxu1 %v2582_v7 }
 0xb26   :  { %2326 = vmatprep.subr.bf16.mxu1 %v2510_v20 }
 0xbde   :  { %v968_v43 = vpop.f32.mrb[24].mxu0 }
 0xbdf   :  { %v975_v44 = vadd.f32 %v968_v43, %v134_v42  ;;  %v970_v45 = vpop.f32.mrb[25].mxu0 }
 0xbe0   :  { %v972_v46 = vpop.f32.mrb[26].mxu0  ;;  %v1000_v52 = vadd.f32 %v2658_v48, %v970_v45 }
 0xbe1   :  { %2425 = vtanh.f32 %v975_v44  ;;  %v973_v47 = vpop.f32.mrb[27].mxu0  ;;  %v2048_v57 = vmul.f32 -1.442695, %v975_v44 }
 0xbeb   :  { %v2426_v49 = vpop.eup %2425  ;;  %v922_v50 = vpop.f32.mrb[10].mxu1 }
 0xbec   :  { %985 = vrot.lane.b32.xlu0 %v2426_v49, %s2506_s16  ;;  %926 = vst.msk [vmem:[%s3013_s7 + $0x10] sm:$0xff] %vm70_vm0, %v922_v50  ;;  %v2206_v51 = vpop.f32.mrb[11].mxu1 }
 0xbf3   :  { %v1042_v53 = vpop.f32.mrb[20].mxu1 }
 0xbf4   :  { %v1048_v39 = vadd.f32 %v1042_v53, %v1000_v52  ;;  %v2213_v54 = vpop.f32.mrb[21].mxu1 }
 0xbf5   :  { %v1045_v55 = vpop.f32.mrb[22].mxu1 }
 0xbf6   :  { %2427 = vtanh.f32 %v1048_v39  ;;  %v2214_v12 = vpop.f32.mrb[23].mxu1  ;;  %v2050_v59 = vmul.f32 -1.442695, %v1048_v39 }
 0xbf7   :  { %2429 = vpow2.f32 %v2048_v57 }
 0xc00   :  { %v2428_v56 = vpop.eup %2427 }
 0xc01   :  { %1058 = vrot.lane.b32.xlu1 %v2428_v56, %s2506_s16  ;;  %v2430_v58 = vpop.eup %2429 }
 0xc02   :  { %v979_v9 = vadd.f32 1.0, %v2430_v58 }
 0xc04   :  { %2431 = vrcp.f32 %v979_v9 }
 0xc05   :  { %2433 = vpow2.f32 %v2050_v59 }
 0xc0e   :  { %v2432_v60 = vpop.eup %2431 }
 0xc0f   :  { %v2434_v63 = vpop.eup %2433  ;;  %v983_v11 = vmul.f32 %v2432_v60, %v2775_v18 }
 0xc10   :  { %v1052_v0 = vadd.f32 1.0, %v2434_v63 }
 0xc12   :  { %2435 = vrcp.f32 %v1052_v0 }
 0xc1c   :  { %v2436_v4 = vpop.eup %2435 }
 0xc1d   :  { %v1056_v17 = vmul.f32 %v2436_v4, %v2780_v28 }
 0xc5e   :  { %v986_v61 = vpop.permute.xlu0 %985 }
 0xc5f   :  { %v988_v62 = vmul.f32 %v2432_v60, %v986_v61 }
 0xc61   :  { %990 = vrot.lane.b32.xlu0 %v988_v62, %s2507_s17 }
 0xc73   :  { %v1059_v5 = vpop.permute.xlu1 %1058 }
 0xc74   :  { %v1061_v10 = vmul.f32 %v2436_v4, %v1059_v5 }
 0xc76   :  { %1063 = vrot.lane.b32.xlu1 %v1061_v10, %s2507_s17 }
 0xcd3   :  { %v991_v13 = vpop.permute.xlu0 %990 }
 0xcd4   :  { %v2819_v14 = vadd.f32 %v991_v13, %v983_v11 }
 0xcd6   :  { %2437 = vtanh.f32 %v2819_v14 }
 0xce0   :  { %v2438_v15 = vpop.eup %2437 }
 0xce1   :  { %996 = vrot.lane.b32.xlu0 %v2438_v15, %s2506_s16 }
 0xce8   :  { %v1064_v21 = vpop.permute.xlu1 %1063 }
 0xce9   :  { %v2824_v23 = vadd.f32 %v1064_v21, %v1056_v17 }
 0xceb   :  { %2439 = vtanh.f32 %v2824_v23 }
 0xcf5   :  { %v2440_v25 = vpop.eup %2439 }
 0xcf6   :  { %1069 = vrot.lane.b32.xlu1 %v2440_v25, %s2506_s16 }
 0xd53   :  { %v997_v29 = vpop.permute.xlu0 %996 }
 0xd54   :  { %v999_v18 = vmul.f32 %v2432_v60, %v997_v29 }
 0xd56   :  { %v1149_v30 = vpack.c.bf16 %v999_v18, %v999_v18 }
 0xd58   :  { %1151 = vrot.lane.b32.xlu0 %v1149_v30, %s2507_s17 }
 0xd68   :  { %v1070_v22 = vpop.permute.xlu1 %1069 }
 0xd69   :  { %v1072_v16 = vmul.f32 %v2436_v4, %v1070_v22 }
 0xd6b   :  { %1074 = vrot.lane.b32.xlu1 %v1072_v16, %s2507_s17  ;;  %v1223_v34 = vpack.c.bf16 %v1072_v16, %v1072_v16 }
 0xd6f   :  { %1225 = vrot.lane.b32.xlu1 %v1223_v34, %s2507_s17 }
 0xdca   :  { %v1152_v28 = vpop.permute.xlu0 %1151 }
 0xdcb   :  { %2052 = vmatmul.mubr.msk.bf16.vlgmr.msra.gmra.mrb[24].mxu1 %vm181_vm2, %v1152_v28 }
 0xdcc   :  { %2328 = vmatpush3.bf16.msra.mxu1 %v2683_v24  ;;  %2242 = vmatprep.mubr.msk.f32.mxu1 %vm2509_vm1, %v2508_v31 }
 0xdcd   :  { %2329 = vmatprep.subr.bf16.mxu1 %v2510_v20 }
 0xdd0   :  { %2331 = vmatpush3.bf16.msra.mxu1 %v2690_v27 }
 0xdd1   :  { %2245 = vmatprep.subr.bf16.mxu1 %v2508_v31 }
 0xddd   :  { %v1075_v35 = vpop.permute.xlu1 %1074 }
 0xdde   :  { %2224 = vmatmul.mubr.msk.f32.vlgmr.msra.gmra.mrb[18].mxu0 %vm181_vm2, %v1075_v35 }
 0xddf   :  { %2227 = vmatpush3.bf16.msra.mxu0 %v2620_v32  ;;  %2230 = vmatprep.mubr.msk.bf16.mxu0 %vm2509_vm1, %v2508_v31 }
 0xde0   :  { %2228 = vmatprep.subr.bf16.mxu0 %v2508_v31 }
 0xde1   :  { %v1226_v36 = vpop.permute.xlu1 %1225 }
 0xde3   :  { %2229 = vmatpush3.bf16.msra.mxu0 %v2627_v33 }
 0xde4   :  { %1378 = vmatprep.subr.bf16.mxu0 %v2558_v2 }
 0xde6   :  { %2231 = vmatmul.mubr.msk.bf16.vlgmr.msra.gmra.mrb[28].mxu0 %vm181_vm2, %v1226_v36 }
 0xde7   :  { %1379 = vmatpush1.bf16.msra.mxu0 %v2563_v3  ;;  %1410 = vmatprep.mubr.bf16.mxu0 %v2505_v1 }
 0xde8   :  { %1380 = vmatprep.subr.bf16.mxu0 %v2577_v6 }
 0xdeb   :  { %1381 = vmatpush1.bf16.msra.mxu0 %v2582_v7 }
 0xdec   :  { %2332 = vmatprep.subr.bf16.mxu0 %v2510_v20 }
 0xe9e   :  { %v1190_v19 = vpop.f32.mrb[24].mxu1 }
 0xe9f   :  { %v1197_v37 = vadd.f32 %v1190_v19, %v137_v26  ;;  %v1192_v42 = vpop.f32.mrb[25].mxu1 }
 0xea0   :  { %v1194_v43 = vpop.f32.mrb[26].mxu1  ;;  %v1222_v49 = vadd.f32 %v2658_v48, %v1192_v42 }
 0xea1   :  { %2441 = vtanh.f32 %v1197_v37  ;;  %v1195_v44 = vpop.f32.mrb[27].mxu1  ;;  %v2053_v54 = vmul.f32 -1.442695, %v1197_v37 }
 0xeab   :  { %v2442_v45 = vpop.eup %2441 }
 0xeac   :  { %1207 = vrot.lane.b32.xlu1 %v2442_v45, %s2506_s16 }
 0xeb1   :  { %v1144_v46 = vpop.f32.mrb[18].mxu0 }
 0xeb2   :  { %1148 = vst.msk [vmem:[%s3013_s7 + $0x18] sm:$0xff] %vm70_vm0, %v1144_v46  ;;  %v2225_v47 = vpop.f32.mrb[19].mxu0 }
 0xeb9   :  { %v1264_v50 = vpop.f32.mrb[28].mxu0 }
 0xeba   :  { %v1270_v41 = vadd.f32 %v1264_v50, %v1222_v49  ;;  %v2232_v51 = vpop.f32.mrb[29].mxu0 }
 0xebb   :  { %v1267_v52 = vpop.f32.mrb[30].mxu0 }
 0xebc   :  { %2443 = vtanh.f32 %v1270_v41  ;;  %v2233_v53 = vpop.f32.mrb[31].mxu0  ;;  %v2055_v56 = vmul.f32 -1.442695, %v1270_v41 }
 0xebd   :  { %2445 = vpow2.f32 %v2053_v54 }
 0xec6   :  { %v2444_v39 = vpop.eup %2443 }
 0xec7   :  { %1280 = vrot.lane.b32.xlu0 %v2444_v39, %s2506_s16  ;;  %v2446_v55 = vpop.eup %2445 }
 0xec8   :  { %v1201_v12 = vadd.f32 1.0, %v2446_v55 }
 0xeca   :  { %2447 = vrcp.f32 %v1201_v12 }
 0xecb   :  { %2449 = vpow2.f32 %v2055_v56 }
 0xed4   :  { %v2448_v57 = vpop.eup %2447 }
 0xed5   :  { %v2450_v59 = vpop.eup %2449  ;;  %v1205_v0 = vmul.f32 %v2448_v57, %v2819_v14 }
 0xed6   :  { %v1274_v60 = vadd.f32 1.0, %v2450_v59 }
 0xed8   :  { %2451 = vrcp.f32 %v1274_v60 }
 0xee2   :  { %v2452_v61 = vpop.eup %2451 }
 0xee3   :  { %v1278_v11 = vmul.f32 %v2452_v61, %v2824_v23 }
 0xf1e   :  { %v1208_v58 = vpop.permute.xlu1 %1207 }
 0xf1f   :  { %v1210_v9 = vmul.f32 %v2448_v57, %v1208_v58 }
 0xf21   :  { %1212 = vrot.lane.b32.xlu1 %v1210_v9, %s2507_s17 }
 0xf39   :  { %v1281_v62 = vpop.permute.xlu0 %1280 }
 0xf3a   :  { %v1283_v63 = vmul.f32 %v2452_v61, %v1281_v62 }
 0xf3c   :  { %1285 = vrot.lane.b32.xlu0 %v1283_v63, %s2507_s17 }
 0xf93   :  { %v1213_v4 = vpop.permute.xlu1 %1212 }
 0xf94   :  { %v2863_v5 = vadd.f32 %v1213_v4, %v1205_v0 }
 0xf96   :  { %2453 = vtanh.f32 %v2863_v5 }
 0xfa0   :  { %v2454_v10 = vpop.eup %2453 }
 0xfa1   :  { %1218 = vrot.lane.b32.xlu1 %v2454_v10, %s2506_s16 }
 0xfae   :  { %v1286_v13 = vpop.permute.xlu0 %1285 }
 0xfaf   :  { %v2868_v15 = vadd.f32 %v1286_v13, %v1278_v11  ;;  %v2930_v11 = vld [vmem:[%s3010_s4] sm:$0xff]   ;;  %v2939_v13 = vld [vmem:[%s3010_s4 + $0x8] sm:$0xff]  }
 0xfb1   :  { %2455 = vtanh.f32 %v2868_v15 }
 0xfbb   :  { %v2456_v17 = vpop.eup %2455 }
 0xfbc   :  { %1291 = vrot.lane.b32.xlu0 %v2456_v17, %s2506_s16 }
0x1013   :  { %v1219_v21 = vpop.permute.xlu1 %1218 }
0x1014   :  { %v1221_v14 = vmul.f32 %v2448_v57, %v1219_v21  ;;  %v2500_v21 = vld [vmem:[%s3007_s3] ss:$8 sps:$4 sm:$0xff]  }
0x1016   :  { %v1371_v25 = vpack.c.bf16 %v1221_v14, %v1221_v14  ;;  %v2501_v14 = vld [vmem:[%s3007_s3 + $0x14] ss:$8 sps:$4 sm:$0xff]  }
0x1018   :  { %1373 = vrot.lane.b32.xlu1 %v1371_v25, %s2507_s17  ;;  %v2502_v25 = vld [vmem:[%s3007_s3 + $0x10] ss:$8 sps:$4 sm:$0xff]  }
0x102e   :  { %v1292_v29 = vpop.permute.xlu0 %1291 }
0x102f   :  { %v1294_v18 = vmul.f32 %v2452_v61, %v1292_v29  ;;  %v2503_v29 = vld [vmem:[%s3009_s2] ss:$0 sm:$0xff] }
0x1031   :  { %1296 = vrot.lane.b32.xlu0 %v1294_v18, %s2507_s17  ;;  %v1445_v30 = vpack.c.bf16 %v1294_v18, %v1294_v18  ;;  %v145_v18 = vadd.f32 %v2503_v29, %v2646_v40 }
0x1035   :  { %1447 = vrot.lane.b32.xlu0 %v1445_v30, %s2507_s17 }
0x108a   :  { %v1374_v23 = vpop.permute.xlu1 %1373 }
0x108b   :  { %2057 = vmatmul.mubr.msk.bf16.vlgmr.msra.gmra.mrb[32].mxu0 %vm181_vm2, %v1374_v23 }
0x108c   :  { %2334 = vmatpush3.bf16.msra.mxu0 %v2683_v24  ;;  %2261 = vmatprep.mubr.msk.f32.mxu0 %vm2509_vm1, %v2508_v31 }
0x108d   :  { %2335 = vmatprep.subr.bf16.mxu0 %v2510_v20 }
0x1090   :  { %2337 = vmatpush3.bf16.msra.mxu0 %v2690_v27 }
0x1091   :  { %2264 = vmatprep.subr.bf16.mxu0 %v2508_v31 }
0x10a3   :  { %v1297_v22 = vpop.permute.xlu0 %1296 }
0x10a4   :  { %2243 = vmatmul.mubr.msk.f32.vlgmr.msra.gmra.mrb[28].mxu1 %vm181_vm2, %v1297_v22 }
0x10a5   :  { %2246 = vmatpush3.bf16.msra.mxu1 %v2620_v32  ;;  %2249 = vmatprep.mubr.msk.bf16.mxu1 %vm2509_vm1, %v2508_v31  ;;  %v142_v32 = vadd.f32 %v2642_v38, %v2596_v8 }
0x10a6   :  { %2247 = vmatprep.subr.bf16.mxu1 %v2508_v31 }
0x10a7   :  { %v1448_v16 = vpop.permute.xlu0 %1447 }
0x10a9   :  { %2248 = vmatpush3.bf16.msra.mxu1 %v2627_v33 }
0x10aa   :  { %1600 = vmatprep.subr.bf16.mxu1 %v2558_v2 }
0x10ac   :  { %2250 = vmatmul.mubr.msk.bf16.vlgmr.msra.gmra.mrb[32].mxu1 %vm181_vm2, %v1448_v16 }
0x10ad   :  { %1601 = vmatpush1.bf16.msra.mxu1 %v2563_v3  ;;  %1632 = vmatprep.mubr.bf16.mxu1 %v2505_v1 }
0x10ae   :  { %1602 = vmatprep.subr.bf16.mxu1 %v2577_v6 }
0x10b1   :  { %1603 = vmatpush1.bf16.msra.mxu1 %v2582_v7 }
0x10b2   :  { %2338 = vmatprep.subr.bf16.mxu1 %v2510_v20 }
0x115e   :  { %v1412_v34 = vpop.f32.mrb[32].mxu0 }
0x115f   :  { %v1419_v33 = vadd.f32 %v1412_v34, %v142_v32  ;;  %v1414_v28 = vpop.f32.mrb[33].mxu0 }
0x1160   :  { %v1416_v2 = vpop.f32.mrb[34].mxu0  ;;  %v1444_v7 = vadd.f32 %v2658_v48, %v1414_v28 }
0x1161   :  { %2457 = vtanh.f32 %v1419_v33  ;;  %v1417_v35 = vpop.f32.mrb[35].mxu0  ;;  %v2058_v43 = vmul.f32 -1.442695, %v1419_v33 }
0x116b   :  { %v2458_v36 = vpop.eup %2457 }
0x116c   :  { %1429 = vrot.lane.b32.xlu0 %v2458_v36, %s2506_s16 }
0x1177   :  { %v1366_v3 = vpop.f32.mrb[28].mxu1 }
0x1178   :  { %1370 = vst.msk [vmem:[%s3013_s7 + $0x20] sm:$0xff] %vm70_vm0, %v1366_v3  ;;  %v2244_v6 = vpop.f32.mrb[29].mxu1 }
0x117f   :  { %v1486_v26 = vpop.f32.mrb[32].mxu1 }
0x1180   :  { %v1492_v8 = vadd.f32 %v1486_v26, %v1444_v7  ;;  %v2251_v38 = vpop.f32.mrb[33].mxu1 }
0x1181   :  { %v1489_v19 = vpop.f32.mrb[34].mxu1 }
0x1182   :  { %2459 = vtanh.f32 %v1492_v8  ;;  %v2252_v37 = vpop.f32.mrb[35].mxu1  ;;  %v2060_v50 = vmul.f32 -1.442695, %v1492_v8 }
0x1183   :  { %2461 = vpow2.f32 %v2058_v43 }
0x118c   :  { %v2460_v42 = vpop.eup %2459 }
0x118d   :  { %1502 = vrot.lane.b32.xlu1 %v2460_v42, %s2506_s16  ;;  %v2462_v44 = vpop.eup %2461 }
0x118e   :  { %v1423_v45 = vadd.f32 1.0, %v2462_v44 }
0x1190   :  { %2463 = vrcp.f32 %v1423_v45 }
0x1191   :  { %2465 = vpow2.f32 %v2060_v50 }
0x119a   :  { %v2464_v46 = vpop.eup %2463 }
0x119b   :  { %v2466_v41 = vpop.eup %2465  ;;  %v1427_v54 = vmul.f32 %v2464_v46, %v2863_v5 }
0x119c   :  { %v1496_v51 = vadd.f32 1.0, %v2466_v41 }
0x119e   :  { %2467 = vrcp.f32 %v1496_v51 }
0x11a8   :  { %v2468_v52 = vpop.eup %2467 }
0x11a9   :  { %v1500_v57 = vmul.f32 %v2468_v52, %v2868_v15  ;;  %v2499_v15 = vld [vmem:[%s3007_s3 + $0x4] ss:$8 sps:$4 sm:$0xff]  }
0x11de   :  { %v1430_v47 = vpop.permute.xlu0 %1429 }
0x11df   :  { %v1432_v49 = vmul.f32 %v2464_v46, %v1430_v47 }
0x11e1   :  { %1434 = vrot.lane.b32.xlu0 %v1432_v49, %s2507_s17 }
0x11ff   :  { %v1503_v53 = vpop.permute.xlu1 %1502 }
0x1200   :  { %v1505_v39 = vmul.f32 %v2468_v52, %v1503_v53 }
0x1202   :  { %1507 = vrot.lane.b32.xlu1 %v1505_v39, %s2507_s17 }
0x1253   :  { %v1435_v55 = vpop.permute.xlu0 %1434 }
0x1254   :  { %v2907_v12 = vadd.f32 %v1435_v55, %v1427_v54 }
0x1256   :  { %2469 = vtanh.f32 %v2907_v12 }
0x1260   :  { %v2470_v56 = vpop.eup %2469 }
0x1261   :  { %1440 = vrot.lane.b32.xlu0 %v2470_v56, %s2506_s16 }
0x1274   :  { %v1508_v58 = vpop.permute.xlu1 %1507 }
0x1275   :  { %v2912_v9 = vadd.f32 %v1508_v58, %v1500_v57 }
0x1277   :  { %2471 = vtanh.f32 %v2912_v9 }
0x1281   :  { %v2472_v59 = vpop.eup %2471 }
0x1282   :  { %1513 = vrot.lane.b32.xlu1 %v2472_v59, %s2506_s16 }
0x12d3   :  { %v1441_v60 = vpop.permute.xlu0 %1440 }
0x12d4   :  { %v1443_v61 = vmul.f32 %v2464_v46, %v1441_v60 }
0x12d6   :  { %v1593_v62 = vpack.c.bf16 %v1443_v61, %v1443_v61 }
0x12d8   :  { %1595 = vrot.lane.b32.xlu0 %v1593_v62, %s2507_s17 }
0x12f4   :  { %v1514_v63 = vpop.permute.xlu1 %1513 }
0x12f5   :  { %v1516_v0 = vmul.f32 %v2468_v52, %v1514_v63 }
0x12f7   :  { %1518 = vrot.lane.b32.xlu1 %v1516_v0, %s2507_s17  ;;  %v1667_v4 = vpack.c.bf16 %v1516_v0, %v1516_v0 }
0x12fb   :  { %1669 = vrot.lane.b32.xlu1 %v1667_v4, %s2507_s17 }
0x134a   :  { %v1596_v5 = vpop.permute.xlu0 %1595 }
0x134b   :  { %2062 = vmatmul.mubr.msk.bf16.vlgmr.msra.gmra.mrb[36].mxu1 %vm181_vm2, %v1596_v5 }
0x134c   :  { %2340 = vmatpush3.bf16.msra.mxu1 %v2683_v24  ;;  %2280 = vmatprep.mubr.msk.f32.mxu1 %vm2509_vm1, %v2508_v31 }
0x134d   :  { %2341 = vmatprep.subr.bf16.mxu1 %v2510_v20 }
0x1350   :  { %2343 = vmatpush3.bf16.msra.mxu1 %v2690_v27 }
0x1351   :  { %2283 = vmatprep.subr.bf16.mxu1 %v2508_v31 }
0x1369   :  { %v1519_v10 = vpop.permute.xlu1 %1518 }
0x136a   :  { %2262 = vmatmul.mubr.msk.f32.vlgmr.msra.gmra.mrb[36].mxu0 %vm181_vm2, %v1519_v10 }
0x136b   :  { %2265 = vmatpush3.bf16.msra.mxu0 %v2930_v11  ;;  %2268 = vmatprep.mubr.msk.bf16.mxu0 %vm2509_vm1, %v2508_v31 }
0x136c   :  { %2266 = vmatprep.subr.bf16.mxu0 %v2508_v31 }
0x136d   :  { %v1670_v17 = vpop.permute.xlu1 %1669 }
0x136f   :  { %2267 = vmatpush3.bf16.msra.mxu0 %v2939_v13 }
0x1370   :  { %1822 = vmatprep.subr.bf16.mxu0 %v2499_v15 }
0x1372   :  { %2269 = vmatmul.mubr.msk.bf16.vlgmr.msra.gmra.mrb[40].mxu0 %vm181_vm2, %v1670_v17 }
0x1373   :  { %1823 = vmatpush1.bf16.msra.mxu0 %v2500_v21  ;;  %1854 = vmatprep.mubr.bf16.mxu0 %v2505_v1 }
0x1374   :  { %1824 = vmatprep.subr.bf16.mxu0 %v2501_v14 }
0x1377   :  { %1825 = vmatpush1.bf16.msra.mxu0 %v2502_v25 }
0x1378   :  { %2344 = vmatprep.subr.bf16.mxu0 %v2510_v20 }
0x141e   :  { %v1634_v30 = vpop.f32.mrb[36].mxu1 }
0x141f   :  { %v1641_v1 = vadd.f32 %v1634_v30, %v145_v18  ;;  %v1636_v23 = vpop.f32.mrb[37].mxu1 }
0x1420   :  { %v1638_v22 = vpop.f32.mrb[38].mxu1  ;;  %v1666_v28 = vadd.f32 %v2658_v48, %v1636_v23 }
0x1421   :  { %2473 = vtanh.f32 %v1641_v1  ;;  %v1639_v16 = vpop.f32.mrb[39].mxu1  ;;  %v2063_v7 = vmul.f32 -1.442695, %v1641_v1 }
0x142b   :  { %v2474_v32 = vpop.eup %2473 }
0x142c   :  { %1651 = vrot.lane.b32.xlu1 %v2474_v32, %s2506_s16 }
0x143d   :  { %v1588_v34 = vpop.f32.mrb[36].mxu0 }
0x143e   :  { %1592 = vst.msk [vmem:[%s3013_s7 + $0x28] sm:$0xff] %vm70_vm0, %v1588_v34  ;;  %v2263_v33 = vpop.f32.mrb[37].mxu0 }
0x1445   :  { %v1708_v2 = vpop.f32.mrb[40].mxu0 }
0x1446   :  { %v1714_v40 = vadd.f32 %v1708_v2, %v1666_v28  ;;  %v2270_v35 = vpop.f32.mrb[41].mxu0 }
0x1447   :  { %v1711_v36 = vpop.f32.mrb[42].mxu0 }
0x1448   :  { %2475 = vtanh.f32 %v1714_v40  ;;  %v2271_v3 = vpop.f32.mrb[43].mxu0  ;;  %v2065_v48 = vmul.f32 -1.442695, %v1714_v40 }
0x1449   :  { %2477 = vpow2.f32 %v2063_v7 }
0x1452   :  { %v2476_v6 = vpop.eup %2475 }
0x1453   :  { %1724 = vrot.lane.b32.xlu0 %v2476_v6, %s2506_s16  ;;  %v2478_v26 = vpop.eup %2477 }
0x1454   :  { %v1645_v8 = vadd.f32 1.0, %v2478_v26 }
0x1456   :  { %2479 = vrcp.f32 %v1645_v8 }
0x1457   :  { %2481 = vpow2.f32 %v2065_v48 }
0x1460   :  { %v2480_v38 = vpop.eup %2479 }
0x1461   :  { %v2482_v42 = vpop.eup %2481  ;;  %v1649_v47 = vmul.f32 %v2480_v38, %v2907_v12 }
0x1462   :  { %v1718_v43 = vadd.f32 1.0, %v2482_v42 }
0x1464   :  { %2483 = vrcp.f32 %v1718_v43 }
0x146e   :  { %v2484_v44 = vpop.eup %2483 }
0x146f   :  { %v1722_v51 = vmul.f32 %v2484_v44, %v2912_v9 }
0x149e   :  { %v1652_v19 = vpop.permute.xlu1 %1651 }
0x149f   :  { %v1654_v37 = vmul.f32 %v2480_v38, %v1652_v19 }
0x14a1   :  { %1656 = vrot.lane.b32.xlu1 %v1654_v37, %s2507_s17 }
0x14c5   :  { %v1725_v45 = vpop.permute.xlu0 %1724 }
0x14c6   :  { %v1727_v46 = vmul.f32 %v2484_v44, %v1725_v45 }
0x14c8   :  { %1729 = vrot.lane.b32.xlu0 %v1727_v46, %s2507_s17 }
0x1513   :  { %v1657_v49 = vpop.permute.xlu1 %1656 }
0x1514   :  { %v1659_v50 = vadd.f32 %v1657_v49, %v1649_v47 }
0x1516   :  { %2485 = vtanh.f32 %v1659_v50 }
0x1520   :  { %v2486_v41 = vpop.eup %2485 }
0x1521   :  { %1662 = vrot.lane.b32.xlu1 %v2486_v41, %s2506_s16 }
0x153a   :  { %v1730_v52 = vpop.permute.xlu0 %1729 }
0x153b   :  { %v1732_v53 = vadd.f32 %v1730_v52, %v1722_v51 }
0x153d   :  { %2487 = vtanh.f32 %v1732_v53 }
0x1547   :  { %v2488_v39 = vpop.eup %2487 }
0x1548   :  { %1735 = vrot.lane.b32.xlu0 %v2488_v39, %s2506_s16 }
0x1593   :  { %v1663_v54 = vpop.permute.xlu1 %1662 }
0x1594   :  { %v1665_v55 = vmul.f32 %v2480_v38, %v1663_v54 }
0x1596   :  { %v1815_v56 = vpack.c.bf16 %v1665_v55, %v1665_v55 }
0x1598   :  { %1817 = vrot.lane.b32.xlu1 %v1815_v56, %s2507_s17 }
0x15ba   :  { %v1736_v12 = vpop.permute.xlu0 %1735 }
0x15bb   :  { %v1738_v57 = vmul.f32 %v2484_v44, %v1736_v12 }
0x15bd   :  { %1740 = vrot.lane.b32.xlu0 %v1738_v57, %s2507_s17  ;;  %v1863_v58 = vpack.c.bf16 %v1738_v57, %v1738_v57 }
0x15c1   :  { %1865 = vrot.lane.b32.xlu0 %v1863_v58, %s2507_s17 }
0x160a   :  { %v1818_v59 = vpop.permute.xlu1 %1817 }
0x160b   :  { %2067 = vmatmul.mubr.msk.bf16.vlgmr.msra.gmra.mrb[44].mxu0 %vm181_vm2, %v1818_v59 }
0x160c   :  { %2346 = vmatpush3.bf16.msra.mxu0 %v2683_v24  ;;  %2299 = vmatprep.mubr.msk.f32.mxu0 %vm2509_vm1, %v2508_v31 }
0x160d   :  { %2347 = vmatprep.subr.bf16.mxu0 %v2510_v20 }
0x1610   :  { %2349 = vmatpush3.bf16.msra.mxu0 %v2690_v27 }
0x162f   :  { %v1741_v9 = vpop.permute.xlu0 %1740 }
0x1630   :  { %2281 = vmatmul.mubr.msk.f32.vlgmr.msra.gmra.mrb[30].mxu1 %vm181_vm2, %v1741_v9 }
0x1631   :  { %2284 = vmatpush3.bf16.msra.mxu1 %v2930_v11  ;;  %2287 = vmatprep.mubr.msk.bf16.mxu1 %vm2509_vm1, %v2508_v31 }
0x1632   :  { %2285 = vmatprep.subr.bf16.mxu1 %v2508_v31  ;;  %v2504_v31 = vld [vmem:[%s3011_s5] ss:$0 sm:$0xff] }
0x1633   :  { %v1866_v24 = vpop.permute.xlu0 %1865 }
0x1635   :  { %2286 = vmatpush3.bf16.msra.mxu1 %v2939_v13 }
0x1638   :  { %2288 = vmatmul.mubr.msk.bf16.vlgmr.msra.gmra.mrb[40].mxu1 %vm181_vm2, %v1866_v24 }
0x16de   :  { %v1856_v60 = vpop.f32.mrb[44].mxu0 }
0x16df   :  { %v1857_v61 = vpop.f32.mrb[45].mxu0 }
0x16e0   :  { %v1859_v20 = vpop.f32.mrb[46].mxu0  ;;  %v1862_v0 = vadd.f32 %v2504_v31, %v1857_v61 }
0x16e1   :  { %v1860_v62 = vpop.f32.mrb[47].mxu0 }
0x1703   :  { %v1810_v27 = vpop.f32.mrb[30].mxu1 }
0x1704   :  { %1814 = vst.msk [vmem:[%s3013_s7 + $0x30] sm:$0xff] %vm70_vm0, %v1810_v27  ;;  %v2282_v63 = vpop.f32.mrb[31].mxu1 }
0x170b   :  { %v1904_v4 = vpop.f32.mrb[40].mxu1 }
0x170c   :  { %v1910_v5 = vadd.f32 %v1904_v4, %v1862_v0  ;;  %v2289_v10 = vpop.f32.mrb[41].mxu1 }
0x170d   :  { %v1907_v11 = vpop.f32.mrb[42].mxu1 }
0x170e   :  { %2489 = vtanh.f32 %v1910_v5  ;;  %v2290_v13 = vpop.f32.mrb[43].mxu1  ;;  %v2069_v17 = vmul.f32 -1.442695, %v1910_v5 }
0x1710   :  { %2491 = vpow2.f32 %v2069_v17 }
0x1718   :  { %v2490_v15 = vpop.eup %2489 }
0x1719   :  { %1920 = vrot.lane.b32.xlu1 %v2490_v15, %s2506_s16 }
0x171a   :  { %v2492_v21 = vpop.eup %2491 }
0x171b   :  { %v1914_v14 = vadd.f32 1.0, %v2492_v21 }
0x171d   :  { %2493 = vrcp.f32 %v1914_v14 }
0x1727   :  { %v2494_v25 = vpop.eup %2493 }
0x1728   :  { %v1918_v30 = vmul.f32 %v2494_v25, %v1732_v53 }
0x178b   :  { %v1921_v29 = vpop.permute.xlu1 %1920 }
0x178c   :  { %v1923_v18 = vmul.f32 %v2494_v25, %v1921_v29 }
0x178e   :  { %1925 = vrot.lane.b32.xlu0 %v1923_v18, %s2507_s17 }
0x1800   :  { %v1926_v1 = vpop.permute.xlu0 %1925 }
0x1801   :  { %v1928_v23 = vadd.f32 %v1926_v1, %v1918_v30 }
0x1803   :  { %2495 = vtanh.f32 %v1928_v23 }
0x180d   :  { %v2496_v22 = vpop.eup %2495 }
0x180e   :  { %1931 = vrot.lane.b32.xlu1 %v2496_v22, %s2506_s16 }
0x1880   :  { %v1932_v16 = vpop.permute.xlu1 %1931 }
0x1881   :  { %v1934_v32 = vmul.f32 %v2494_v25, %v1932_v16 }
0x1883   :  { %1936 = vrot.lane.b32.xlu0 %v1934_v32, %s2507_s17 }
0x18f5   :  { %v1937_v34 = vpop.permute.xlu0 %1936 }
0x18f6   :  { %2300 = vmatmul.mubr.msk.f32.vlgmr.msra.gmra.mrb[38].mxu0 %vm181_vm2, %v1937_v34 }
0x19c9   :  { %v2006_v33 = vpop.f32.mrb[38].mxu0 }
0x19ca   :  { %2010 = vst.msk [vmem:[%s3013_s7 + $0x38] sm:$0xff] %vm70_vm0, %v2006_v33  ;;  %v2301_v28 = vpop.f32.mrb[39].mxu0 }

</bundles_post_ra>
